<compile_context>
chip_gen: v7x
topology: tpu7x:2x2x1
jax: 0.10.0
libtpu: 0.0.40
codegen_flags: <defaults>
</compile_context>

<pallas_src>
import math

import jax
import jax.numpy as jnp
from jax.experimental import pallas as pl
from jax.experimental.pallas import tpu as pltpu


# ----------------------------- parameter glue --------------------------------

def fft_shift_matrix(n, s):
    idx = jnp.arange(n)
    shift = (idx[None, :] + idx[:, None]).astype(jnp.float32)
    return jnp.exp(2j * jnp.pi * s * shift / n)          # (n, n) complex64


def _complex_inv(m):
    """Batched complex matrix inverse via the equivalent real 2k x 2k system
    (avoids relying on complex LU support on TPU)."""
    a, b = jnp.real(m), jnp.imag(m)
    k = m.shape[-1]
    big = jnp.concatenate(
        [jnp.concatenate([a, -b], axis=-1),
         jnp.concatenate([b, a], axis=-1)], axis=-2)
    big_inv = jnp.linalg.inv(big)
    return big_inv[..., :k, :k] + 1j * big_inv[..., k:, :k]


def cayley(w):
    """Complex Cayley transform, faithful to the PyTorch reference."""
    if w.ndim == 2:
        return cayley(w[None])[0]
    _, cout, cin = w.shape
    if cin > cout:
        return jnp.transpose(cayley(jnp.transpose(w, (0, 2, 1))), (0, 2, 1))
    u, v = w[:, :cin], w[:, cin:]
    eye = jnp.eye(cin, dtype=w.dtype)[None]
    uh = jnp.conjugate(jnp.transpose(u, (0, 2, 1)))
    vh = jnp.conjugate(jnp.transpose(v, (0, 2, 1)))
    a = u - uh + vh @ v
    i_ipa = _complex_inv(eye + a)
    return jnp.concatenate([i_ipa @ (eye - a), -2.0 * (v @ i_ipa)], axis=1)


def make_qfft(weight, n):
    """Eval-mode cached Qfft: (F, cout, cin) complex, F = n*(n//2+1)."""
    cout, cin, ksz, _ = weight.shape
    m = n // 2 + 1
    fsize = n * m
    s = (ksz - 1) // 2
    shift = fft_shift_matrix(n, -s)[:, :m].reshape(fsize, 1, 1)
    wfft = jnp.fft.rfft2(weight, s=(n, n)).reshape(cout, cin, fsize)
    wfft = shift * jnp.conjugate(jnp.transpose(wfft, (2, 0, 1)))   # (F, cout, cin)
    norm = jnp.sqrt(jnp.sum(jnp.abs(wfft) ** 2))
    alpha = norm                      # PyTorch init: alpha <- wfft.norm()
    return cayley(alpha * wfft / norm)


# ------------------------------- Pallas kernel --------------------------------

def _freq_channel_mix_kernel(xr_ref, xi_ref, qr_ref, qi_ref, yr_ref, yi_ref):
    """Per-frequency complex channel mix, real/imag split, frequencies on lanes.

    yr/yi block shape: (B, cout, Fb);   x refs: (cin, B, Fb);   q refs: (cin, cout, Fb)
    y[b, co, f] = sum_ci Q[co, ci, f] * X[b, ci, f]   (complex)
    """
    cin = qr_ref.shape[0]
    yr = jnp.zeros(yr_ref.shape, jnp.float32)
    yi = jnp.zeros(yi_ref.shape, jnp.float32)
    for ci in range(cin):                         # static unroll: cin is small
        xr_c = xr_ref[ci][:, None, :]             # (B, 1, Fb)
        xi_c = xi_ref[ci][:, None, :]
        qr_c = qr_ref[ci][None, :, :]             # (1, cout, Fb)
        qi_c = qi_ref[ci][None, :, :]
        yr = yr + (qr_c * xr_c - qi_c * xi_c)
        yi = yi + (qr_c * xi_c + qi_c * xr_c)
    yr_ref[...] = yr
    yi_ref[...] = yi


def orthogon_conv_lin_forward(x, weight, bias, *, scale=1.0, f_block=128):
    batch, cin, n, _ = x.shape
    cout = weight.shape[0]
    m = n // 2 + 1
    fsize = n * m
    assert f_block % 128 == 0
    f_pad = f_block * pl.cdiv(fsize, f_block)     # lane-pad F to the tile grid
    pad = f_pad - fsize

    # ---- one-time weight setup: Cayley in FFT domain, scale folded in -------
    qfft = scale * make_qfft(weight, n)                        # (F, cout, cin)
    qt = jnp.transpose(qfft, (2, 1, 0))                        # (cin, cout, F)
    qr = jnp.pad(jnp.real(qt), ((0, 0), (0, 0), (0, pad))).astype(jnp.float32)
    qi = jnp.pad(jnp.imag(qt), ((0, 0), (0, 0), (0, pad))).astype(jnp.float32)

    # ---- data path: rfft2 (XLA FFT) then Pallas frequency-domain mix --------
    xfft = jnp.fft.rfft2(x).reshape(batch, cin, fsize)         # (B, cin, F) complex
    xt = jnp.transpose(xfft, (1, 0, 2))                        # (cin, B, F)
    xr = jnp.pad(jnp.real(xt), ((0, 0), (0, 0), (0, pad))).astype(jnp.float32)
    xi = jnp.pad(jnp.imag(xt), ((0, 0), (0, 0), (0, pad))).astype(jnp.float32)

    x_spec = pl.BlockSpec((cin, batch, f_block), lambda i: (0, 0, i))
    q_spec = pl.BlockSpec((cin, cout, f_block), lambda i: (0, 0, i))
    y_spec = pl.BlockSpec((batch, cout, f_block), lambda i: (0, 0, i))

    yr, yi = pl.pallas_call(
        _freq_channel_mix_kernel,
        out_shape=(jax.ShapeDtypeStruct((batch, cout, f_pad), jnp.float32),
                   jax.ShapeDtypeStruct((batch, cout, f_pad), jnp.float32)),
        grid_spec=pltpu.PrefetchScalarGridSpec(
            num_scalar_prefetch=0,
            grid=(f_pad // f_block,),
            in_specs=[x_spec, x_spec, q_spec, q_spec],
            out_specs=[y_spec, y_spec],
        ),
        compiler_params=pltpu.CompilerParams(
            dimension_semantics=("parallel",)),
    )(xr, xi, qr, qi)

    yfft = (yr[:, :, :fsize] + 1j * yi[:, :, :fsize]).reshape(batch, cout, n, m)
    y = jnp.fft.irfft2(yfft)
    if bias is not None:
        y = y + bias[:, None, None]
    return y


# ------------------------------ pure-JAX reference ----------------------------

def orthogon_conv_lin_ref(x, weight, bias, scale=1.0):
    """Literal transcription of the PyTorch forward (eval mode)."""
    batch, cin, n, _ = x.shape
    cout, _, ksz, _ = weight.shape
    m = n // 2 + 1
    fsize = n * m
    x = scale * x
    s = (ksz - 1) // 2
    shift = fft_shift_matrix(n, -s)[:, :m].reshape(fsize, 1, 1)
    xfft = jnp.transpose(jnp.fft.rfft2(x), (2, 3, 1, 0)).reshape(fsize, cin, batch)
    wfft = shift * jnp.conjugate(jnp.transpose(
        jnp.fft.rfft2(weight, s=(n, n)).reshape(cout, cin, fsize), (2, 0, 1)))
    norm = jnp.sqrt(jnp.sum(jnp.abs(wfft) ** 2))
    qfft = cayley(norm * wfft / norm)                 # alpha == wfft.norm() at init
    yfft = jnp.matmul(qfft, xfft).reshape(n, m, cout, batch)
    y = jnp.fft.irfft2(jnp.transpose(yfft, (3, 2, 0, 1)))
    if bias is not None:
        y = y + bias[:, None, None]
    return y


# ----------------------------------- main --------------------------------------

if __name__ == "__main__":
    batch, cin, n = 2, 4, 16
    cout, ksz = 8, 3
    scale = 1.0

    key = jax.random.PRNGKey(0)
    k_w, k_b, k_x = jax.random.split(key, 3)
    weight = jax.random.normal(k_w, (cout, cin, ksz, ksz), jnp.float32) * math.sqrt(
        2.0 / (cin * ksz * ksz + cout))
    bias = 0.1 * jax.random.normal(k_b, (cout,), jnp.float32)
    x = jax.random.normal(k_x, (batch, cin, n, n), jnp.float32)

    fwd = jax.jit(lambda xx, ww, bb: orthogon_conv_lin_forward(xx, ww, bb, scale=scale))
    y = jax.block_until_ready(fwd(x, weight, bias))

    y_ref = orthogon_conv_lin_ref(x, weight, bias, scale=scale)
    assert y.shape == (batch, cout, n, n)
    err = float(jnp.max(jnp.abs(y - y_ref)))
    assert jnp.allclose(y, y_ref, rtol=1e-4, atol=1e-4), err
    print("KERNEL_OK")
</pallas_src>

<mosaic_0001>
module attributes {stable_mosaic.version = 11 : i64} {
  func.func private @main(%arg0: i32) attributes {dimension_semantics = [#tpu.dimension_semantics<core_parallel>], iteration_bounds = array<i64: 2>, tpu.core_type = #tpu.core_type<sc_scalar_subcore>, window_params = []} {
    return
  }
}

module attributes {stable_mosaic.version = 11 : i64} {
  func.func private @main(%arg0: i32) attributes {dimension_semantics = [#tpu.dimension_semantics<core_parallel>], iteration_bounds = array<i64: 2>, tpu.core_type = #tpu.core_type<sc_scalar_subcore>, window_params = []} {
    return
  }
}

module attributes {stable_mosaic.version = 11 : i64} {
  func.func @_freq_channel_mix_kernel(%arg0: i32, %arg1: memref<4x2x128xf32, #tpu.memory_space<vmem>>, %arg2: memref<4x2x128xf32, #tpu.memory_space<vmem>>, %arg3: memref<4x8x128xf32, #tpu.memory_space<vmem>>, %arg4: memref<4x8x128xf32, #tpu.memory_space<vmem>>, %arg5: memref<2x8x128xf32, #tpu.memory_space<vmem>>, %arg6: memref<2x8x128xf32, #tpu.memory_space<vmem>>) attributes {dimension_semantics = [#tpu.dimension_semantics<parallel>], iteration_bounds = array<i64: 2>, scalar_prefetch = 0 : i64, scratch_operands = 0 : i64, tpu.core_type = #tpu.core_type<tc>, window_params = [{transform_indices = @transform_0, window_bounds = array<i64: 4, 2, 128>}, {transform_indices = @transform_1, window_bounds = array<i64: 4, 2, 128>}, {transform_indices = @transform_2, window_bounds = array<i64: 4, 8, 128>}, {transform_indices = @transform_3, window_bounds = array<i64: 4, 8, 128>}, {transform_indices = @transform_4, window_bounds = array<i64: 2, 8, 128>}, {transform_indices = @transform_5, window_bounds = array<i64: 2, 8, 128>}]} {
    %cst = arith.constant 0.000000e+00 : f32
    %0 = vector.broadcast %cst : f32 to vector<2x8x128xf32>
    %cst_0 = arith.constant 0.000000e+00 : f32
    %1 = vector.broadcast %cst_0 : f32 to vector<2x8x128xf32>
    %c0 = arith.constant 0 : index
    %c0_1 = arith.constant 0 : index
    %c0_2 = arith.constant 0 : index
    %2 = vector.load %arg1[%c0, %c0_1, %c0_2] : memref<4x2x128xf32, #tpu.memory_space<vmem>>, vector<1x2x128xf32>
    %3 = vector.shape_cast %2 : vector<1x2x128xf32> to vector<2x128xf32>
    %4 = vector.shape_cast %3 : vector<2x128xf32> to vector<2x1x128xf32>
    %c0_3 = arith.constant 0 : index
    %c0_4 = arith.constant 0 : index
    %c0_5 = arith.constant 0 : index
    %5 = vector.load %arg2[%c0_3, %c0_4, %c0_5] : memref<4x2x128xf32, #tpu.memory_space<vmem>>, vector<1x2x128xf32>
    %6 = vector.shape_cast %5 : vector<1x2x128xf32> to vector<2x128xf32>
    %7 = vector.shape_cast %6 : vector<2x128xf32> to vector<2x1x128xf32>
    %c0_6 = arith.constant 0 : index
    %c0_7 = arith.constant 0 : index
    %c0_8 = arith.constant 0 : index
    %8 = vector.load %arg3[%c0_6, %c0_7, %c0_8] : memref<4x8x128xf32, #tpu.memory_space<vmem>>, vector<1x8x128xf32>
    %9 = vector.shape_cast %8 : vector<1x8x128xf32> to vector<8x128xf32>
    %10 = vector.shape_cast %9 : vector<8x128xf32> to vector<1x8x128xf32>
    %c0_9 = arith.constant 0 : index
    %c0_10 = arith.constant 0 : index
    %c0_11 = arith.constant 0 : index
    %11 = vector.load %arg4[%c0_9, %c0_10, %c0_11] : memref<4x8x128xf32, #tpu.memory_space<vmem>>, vector<1x8x128xf32>
    %12 = vector.shape_cast %11 : vector<1x8x128xf32> to vector<8x128xf32>
    %13 = vector.shape_cast %12 : vector<8x128xf32> to vector<1x8x128xf32>
    %14 = vector.broadcast %10 : vector<1x8x128xf32> to vector<2x8x128xf32>
    %15 = vector.broadcast %4 : vector<2x1x128xf32> to vector<2x8x128xf32>
    %16 = arith.mulf %14, %15 : vector<2x8x128xf32>
    %17 = vector.broadcast %13 : vector<1x8x128xf32> to vector<2x8x128xf32>
    %18 = vector.broadcast %7 : vector<2x1x128xf32> to vector<2x8x128xf32>
    %19 = arith.mulf %17, %18 : vector<2x8x128xf32>
    %20 = arith.subf %16, %19 : vector<2x8x128xf32>
    %21 = arith.addf %0, %20 : vector<2x8x128xf32>
    %22 = vector.broadcast %10 : vector<1x8x128xf32> to vector<2x8x128xf32>
    %23 = vector.broadcast %7 : vector<2x1x128xf32> to vector<2x8x128xf32>
    %24 = arith.mulf %22, %23 : vector<2x8x128xf32>
    %25 = vector.broadcast %13 : vector<1x8x128xf32> to vector<2x8x128xf32>
    %26 = vector.broadcast %4 : vector<2x1x128xf32> to vector<2x8x128xf32>
    %27 = arith.mulf %25, %26 : vector<2x8x128xf32>
    %28 = arith.addf %24, %27 : vector<2x8x128xf32>
    %29 = arith.addf %1, %28 : vector<2x8x128xf32>
    %c1 = arith.constant 1 : index
    %c0_12 = arith.constant 0 : index
    %c0_13 = arith.constant 0 : index
    %30 = vector.load %arg1[%c1, %c0_12, %c0_13] : memref<4x2x128xf32, #tpu.memory_space<vmem>>, vector<1x2x128xf32>
    %31 = vector.shape_cast %30 : vector<1x2x128xf32> to vector<2x128xf32>
    %32 = vector.shape_cast %31 : vector<2x128xf32> to vector<2x1x128xf32>
    %c1_14 = arith.constant 1 : index
    %c0_15 = arith.constant 0 : index
    %c0_16 = arith.constant 0 : index
    %33 = vector.load %arg2[%c1_14, %c0_15, %c0_16] : memref<4x2x128xf32, #tpu.memory_space<vmem>>, vector<1x2x128xf32>
    %34 = vector.shape_cast %33 : vector<1x2x128xf32> to vector<2x128xf32>
    %35 = vector.shape_cast %34 : vector<2x128xf32> to vector<2x1x128xf32>
    %c1_17 = arith.constant 1 : index
    %c0_18 = arith.constant 0 : index
    %c0_19 = arith.constant 0 : index
    %36 = vector.load %arg3[%c1_17, %c0_18, %c0_19] : memref<4x8x128xf32, #tpu.memory_space<vmem>>, vector<1x8x128xf32>
    %37 = vector.shape_cast %36 : vector<1x8x128xf32> to vector<8x128xf32>
    %38 = vector.shape_cast %37 : vector<8x128xf32> to vector<1x8x128xf32>
    %c1_20 = arith.constant 1 : index
    %c0_21 = arith.constant 0 : index
    %c0_22 = arith.constant 0 : index
    %39 = vector.load %arg4[%c1_20, %c0_21, %c0_22] : memref<4x8x128xf32, #tpu.memory_space<vmem>>, vector<1x8x128xf32>
    %40 = vector.shape_cast %39 : vector<1x8x128xf32> to vector<8x128xf32>
    %41 = vector.shape_cast %40 : vector<8x128xf32> to vector<1x8x128xf32>
    %42 = vector.broadcast %38 : vector<1x8x128xf32> to vector<2x8x128xf32>
    %43 = vector.broadcast %32 : vector<2x1x128xf32> to vector<2x8x128xf32>
    %44 = arith.mulf %42, %43 : vector<2x8x128xf32>
    %45 = vector.broadcast %41 : vector<1x8x128xf32> to vector<2x8x128xf32>
    %46 = vector.broadcast %35 : vector<2x1x128xf32> to vector<2x8x128xf32>
    %47 = arith.mulf %45, %46 : vector<2x8x128xf32>
    %48 = arith.subf %44, %47 : vector<2x8x128xf32>
    %49 = arith.addf %21, %48 : vector<2x8x128xf32>
    %50 = vector.broadcast %38 : vector<1x8x128xf32> to vector<2x8x128xf32>
    %51 = vector.broadcast %35 : vector<2x1x128xf32> to vector<2x8x128xf32>
    %52 = arith.mulf %50, %51 : vector<2x8x128xf32>
    %53 = vector.broadcast %41 : vector<1x8x128xf32> to vector<2x8x128xf32>
    %54 = vector.broadcast %32 : vector<2x1x128xf32> to vector<2x8x128xf32>
    %55 = arith.mulf %53, %54 : vector<2x8x128xf32>
    %56 = arith.addf %52, %55 : vector<2x8x128xf32>
    %57 = arith.addf %29, %56 : vector<2x8x128xf32>
    %c2 = arith.constant 2 : index
    %c0_23 = arith.constant 0 : index
    %c0_24 = arith.constant 0 : index
    %58 = vector.load %arg1[%c2, %c0_23, %c0_24] : memref<4x2x128xf32, #tpu.memory_space<vmem>>, vector<1x2x128xf32>
    %59 = vector.shape_cast %58 : vector<1x2x128xf32> to vector<2x128xf32>
    %60 = vector.shape_cast %59 : vector<2x128xf32> to vector<2x1x128xf32>
    %c2_25 = arith.constant 2 : index
    %c0_26 = arith.constant 0 : index
    %c0_27 = arith.constant 0 : index
    %61 = vector.load %arg2[%c2_25, %c0_26, %c0_27] : memref<4x2x128xf32, #tpu.memory_space<vmem>>, vector<1x2x128xf32>
    %62 = vector.shape_cast %61 : vector<1x2x128xf32> to vector<2x128xf32>
    %63 = vector.shape_cast %62 : vector<2x128xf32> to vector<2x1x128xf32>
    %c2_28 = arith.constant 2 : index
    %c0_29 = arith.constant 0 : index
    %c0_30 = arith.constant 0 : index
    %64 = vector.load %arg3[%c2_28, %c0_29, %c0_30] : memref<4x8x128xf32, #tpu.memory_space<vmem>>, vector<1x8x128xf32>
    %65 = vector.shape_cast %64 : vector<1x8x128xf32> to vector<8x128xf32>
    %66 = vector.shape_cast %65 : vector<8x128xf32> to vector<1x8x128xf32>
    %c2_31 = arith.constant 2 : index
    %c0_32 = arith.constant 0 : index
    %c0_33 = arith.constant 0 : index
    %67 = vector.load %arg4[%c2_31, %c0_32, %c0_33] : memref<4x8x128xf32, #tpu.memory_space<vmem>>, vector<1x8x128xf32>
    %68 = vector.shape_cast %67 : vector<1x8x128xf32> to vector<8x128xf32>
    %69 = vector.shape_cast %68 : vector<8x128xf32> to vector<1x8x128xf32>
    %70 = vector.broadcast %66 : vector<1x8x128xf32> to vector<2x8x128xf32>
    %71 = vector.broadcast %60 : vector<2x1x128xf32> to vector<2x8x128xf32>
    %72 = arith.mulf %70, %71 : vector<2x8x128xf32>
    %73 = vector.broadcast %69 : vector<1x8x128xf32> to vector<2x8x128xf32>
    %74 = vector.broadcast %63 : vector<2x1x128xf32> to vector<2x8x128xf32>
    %75 = arith.mulf %73, %74 : vector<2x8x128xf32>
    %76 = arith.subf %72, %75 : vector<2x8x128xf32>
    %77 = arith.addf %49, %76 : vector<2x8x128xf32>
    %78 = vector.broadcast %66 : vector<1x8x128xf32> to vector<2x8x128xf32>
    %79 = vector.broadcast %63 : vector<2x1x128xf32> to vector<2x8x128xf32>
    %80 = arith.mulf %78, %79 : vector<2x8x128xf32>
    %81 = vector.broadcast %69 : vector<1x8x128xf32> to vector<2x8x128xf32>
    %82 = vector.broadcast %60 : vector<2x1x128xf32> to vector<2x8x128xf32>
    %83 = arith.mulf %81, %82 : vector<2x8x128xf32>
    %84 = arith.addf %80, %83 : vector<2x8x128xf32>
    %85 = arith.addf %57, %84 : vector<2x8x128xf32>
    %c3 = arith.constant 3 : index
    %c0_34 = arith.constant 0 : index
    %c0_35 = arith.constant 0 : index
    %86 = vector.load %arg1[%c3, %c0_34, %c0_35] : memref<4x2x128xf32, #tpu.memory_space<vmem>>, vector<1x2x128xf32>
    %87 = vector.shape_cast %86 : vector<1x2x128xf32> to vector<2x128xf32>
    %88 = vector.shape_cast %87 : vector<2x128xf32> to vector<2x1x128xf32>
    %c3_36 = arith.constant 3 : index
    %c0_37 = arith.constant 0 : index
    %c0_38 = arith.constant 0 : index
    %89 = vector.load %arg2[%c3_36, %c0_37, %c0_38] : memref<4x2x128xf32, #tpu.memory_space<vmem>>, vector<1x2x128xf32>
    %90 = vector.shape_cast %89 : vector<1x2x128xf32> to vector<2x128xf32>
    %91 = vector.shape_cast %90 : vector<2x128xf32> to vector<2x1x128xf32>
    %c3_39 = arith.constant 3 : index
    %c0_40 = arith.constant 0 : index
    %c0_41 = arith.constant 0 : index
    %92 = vector.load %arg3[%c3_39, %c0_40, %c0_41] : memref<4x8x128xf32, #tpu.memory_space<vmem>>, vector<1x8x128xf32>
    %93 = vector.shape_cast %92 : vector<1x8x128xf32> to vector<8x128xf32>
    %94 = vector.shape_cast %93 : vector<8x128xf32> to vector<1x8x128xf32>
    %c3_42 = arith.constant 3 : index
    %c0_43 = arith.constant 0 : index
    %c0_44 = arith.constant 0 : index
    %95 = vector.load %arg4[%c3_42, %c0_43, %c0_44] : memref<4x8x128xf32, #tpu.memory_space<vmem>>, vector<1x8x128xf32>
    %96 = vector.shape_cast %95 : vector<1x8x128xf32> to vector<8x128xf32>
    %97 = vector.shape_cast %96 : vector<8x128xf32> to vector<1x8x128xf32>
    %98 = vector.broadcast %94 : vector<1x8x128xf32> to vector<2x8x128xf32>
    %99 = vector.broadcast %88 : vector<2x1x128xf32> to vector<2x8x128xf32>
    %100 = arith.mulf %98, %99 : vector<2x8x128xf32>
    %101 = vector.broadcast %97 : vector<1x8x128xf32> to vector<2x8x128xf32>
    %102 = vector.broadcast %91 : vector<2x1x128xf32> to vector<2x8x128xf32>
    %103 = arith.mulf %101, %102 : vector<2x8x128xf32>
    %104 = arith.subf %100, %103 : vector<2x8x128xf32>
    %105 = arith.addf %77, %104 : vector<2x8x128xf32>
    %106 = vector.broadcast %94 : vector<1x8x128xf32> to vector<2x8x128xf32>
    %107 = vector.broadcast %91 : vector<2x1x128xf32> to vector<2x8x128xf32>
    %108 = arith.mulf %106, %107 : vector<2x8x128xf32>
    %109 = vector.broadcast %97 : vector<1x8x128xf32> to vector<2x8x128xf32>
    %110 = vector.broadcast %88 : vector<2x1x128xf32> to vector<2x8x128xf32>
    %111 = arith.mulf %109, %110 : vector<2x8x128xf32>
    %112 = arith.addf %108, %111 : vector<2x8x128xf32>
    %113 = arith.addf %85, %112 : vector<2x8x128xf32>
    %c0_45 = arith.constant 0 : index
    %c0_46 = arith.constant 0 : index
    %c0_47 = arith.constant 0 : index
    %114 = vector.load %arg5[%c0_45, %c0_46, %c0_47] : memref<2x8x128xf32, #tpu.memory_space<vmem>>, vector<2x8x128xf32>
    tpu.vector_store %arg5[%c0_45, %c0_46, %c0_47], %105 {strides = array<i32>} : memref<2x8x128xf32, #tpu.memory_space<vmem>>, vector<2x8x128xf32>,
    %c0_48 = arith.constant 0 : index
    %c0_49 = arith.constant 0 : index
    %c0_50 = arith.constant 0 : index
    %115 = vector.load %arg6[%c0_48, %c0_49, %c0_50] : memref<2x8x128xf32, #tpu.memory_space<vmem>>, vector<2x8x128xf32>
    tpu.vector_store %arg6[%c0_48, %c0_49, %c0_50], %113 {strides = array<i32>} : memref<2x8x128xf32, #tpu.memory_space<vmem>>, vector<2x8x128xf32>,
    return
  }
  func.func @transform_0(%arg0: i32) -> (i32, i32, i32) {
    %c0_i32 = arith.constant 0 : i32
    %c0_i32_0 = arith.constant 0 : i32
    %c0_i32_1 = arith.constant 0 : i32
    return %c0_i32, %c0_i32_0, %arg0 : i32, i32, i32
  }
  func.func @transform_1(%arg0: i32) -> (i32, i32, i32) {
    %c0_i32 = arith.constant 0 : i32
    %c0_i32_0 = arith.constant 0 : i32
    %c0_i32_1 = arith.constant 0 : i32
    return %c0_i32, %c0_i32_0, %arg0 : i32, i32, i32
  }
  func.func @transform_2(%arg0: i32) -> (i32, i32, i32) {
    %c0_i32 = arith.constant 0 : i32
    %c0_i32_0 = arith.constant 0 : i32
    %c0_i32_1 = arith.constant 0 : i32
    return %c0_i32, %c0_i32_0, %arg0 : i32, i32, i32
  }
  func.func @transform_3(%arg0: i32) -> (i32, i32, i32) {
    %c0_i32 = arith.constant 0 : i32
    %c0_i32_0 = arith.constant 0 : i32
    %c0_i32_1 = arith.constant 0 : i32
    return %c0_i32, %c0_i32_0, %arg0 : i32, i32, i32
  }
  func.func @transform_4(%arg0: i32) -> (i32, i32, i32) {
    %c0_i32 = arith.constant 0 : i32
    %c0_i32_0 = arith.constant 0 : i32
    %c0_i32_1 = arith.constant 0 : i32
    return %c0_i32, %c0_i32_0, %arg0 : i32, i32, i32
  }
  func.func @transform_5(%arg0: i32) -> (i32, i32, i32) {
    %c0_i32 = arith.constant 0 : i32
    %c0_i32_0 = arith.constant 0 : i32
    %c0_i32_1 = arith.constant 0 : i32
    return %c0_i32, %c0_i32_0, %arg0 : i32, i32, i32
  }
}

</mosaic_0001>

<bundles_post_ra>
// kernel: mul.2
= control target key start
LH: loop header
LB: loop body
LE: loop exit
PB: predicated region body
PF: predicated region fallthrough
CT: control target
= control target key end

     0   :  { %vm9_vm0 = vcmask 15360   ;;  %s140_s12 = smov 126   ;;  %s141_s13 = smov 108   ;;  %vm3_vm1 = vcmask 72704   ;;  %vm13_vm2 = vcmask 56320   ;;  %vm16_vm3 = vcmask 1048560   ;;  %s219_s0 = inlined_call_operand.vmem [shape: f32[16,9], index: 0, kind: input, shape index: {}]   ;;  %s220_s1 = inlined_call_operand.vmem [shape: f32[144], index: 1, kind: output, shape index: {}]  }
   0x1   :  { %v109_v0 = vld [vmem:[%s219_s0 + $0xe] sm:$0x1]   ;;  %v112_v3 = vld [vmem:[%s219_s0 + $0xc] sm:$0x1]   ;;  %v111_v4 = vld [vmem:[%s219_s0 + $0xd] sm:$0x1]  }
   0x2   :  { %v110_v1 = vld [vmem:[%s219_s0 + $0xe] sm:$0x1]   ;;  %26 = vrot.lane.b32.xlu1 %v112_v3, %s141_s13  ;;  %v113_v5 = vld [vmem:[%s219_s0 + $0xb] sm:$0x1]   ;;  %s142_s18 = smov 117   ;;  %s143_s19 = smov 99  }
   0x3   :  { %v10_v2 = vsel %vm9_vm0, %v110_v1, %v109_v0  ;;  %v114_v6 = vld [vmem:[%s219_s0 + $0xa] sm:$0x1]   ;;  %v115_v7 = vld [vmem:[%s219_s0 + $0x9] sm:$0x1]   ;;  %v2_v8 = vld [vmem:[%s219_s0] sm:$0x1]  }
   0x4   :  { %11 = vrot.lane.b32.xlu0 %v10_v2, %s140_s12  ;;  %4 = vst.msk [vmem:[#allocation0] sm:$0x1] %vm3_vm1, %v2_v8   ;;  %s144_s26 = smov 90   ;;  %s145_s27 = smov 81   ;;  %v116_v9 = vld [vmem:[%s219_s0 + $0x8] sm:$0x1]  }
   0x5   :  { %v117_v10 = vld [vmem:[%s219_s0 + $0x7] sm:$0x1]   ;;  %s146_s3 = smov 72   ;;  %s147_s4 = smov 63   ;;  %v118_v11 = vld [vmem:[%s219_s0 + $0x6] sm:$0x1]  }
   0x6   :  { %32 = vrot.lane.b32.xlu1 %v113_v5, %s143_s19  ;;  %v119_v12 = vld [vmem:[%s219_s0 + $0x5] sm:$0x1]   ;;  %s148_s9 = smov 54   ;;  %s149_s10 = smov 45   ;;  %v120_v13 = vld [vmem:[%s219_s0 + $0x4] sm:$0x1]  }
   0x7   :  { %v121_v14 = vld [vmem:[%s219_s0 + $0x3] sm:$0x1]   ;;  %s150_s15 = smov 36   ;;  %s151_s16 = smov 27   ;;  %v122_v15 = vld [vmem:[%s219_s0 + $0x2] sm:$0x1]  }
   0x8   :  { %20 = vrot.lane.b32.xlu0 %v111_v4, %s142_s18  ;;  %v123_v16 = vld [vmem:[%s219_s0 + $0x1] sm:$0x1]   ;;  %s152_s21 = smov 18   ;;  %s153_s22 = smov 9   ;;  %v124_v17 = vld [vmem:[%s219_s0 + $0xf] sm:$0x1]  }
   0x9   :  { %s154_s0 = smov 7   ;;  %vm22_vm4 = vcmask 1032104   ;;  %vm28_vm5 = vcmask 958304   ;;  %vm34_vm6 = vcmask 884504   ;;  %vm40_vm7 = vcmask 810704  }
   0xa   :  { %44 = vrot.lane.b32.xlu1 %v115_v7, %s145_s27  ;;  %vm46_vm8 = vcmask 736904   ;;  %vm52_vm9 = vcmask 663104   ;;  %vm58_vm10 = vcmask 589304   ;;  %vm64_vm11 = vcmask 515504  }
   0xb   :  { %vm70_vm12 = vcmask 441704   ;;  %vm76_vm13 = vcmask 367904   ;;  %vm82_vm14 = vcmask 294104   ;;  %vm88_vm15 = vcmask 220304  }
   0xc   :  { %38 = vrot.lane.b32.xlu0 %v114_v6, %s144_s26  ;;  %vm94_vm0 = vcmask 146504   ;;  %vm100_vm1 = vcmask 130104  }
   0xe   :  { %56 = vrot.lane.b32.xlu1 %v117_v10, %s147_s4 }
  0x10   :  { %50 = vrot.lane.b32.xlu0 %v116_v9, %s146_s3 }
  0x12   :  { %68 = vrot.lane.b32.xlu1 %v119_v12, %s149_s10 }
  0x14   :  { %62 = vrot.lane.b32.xlu0 %v118_v11, %s148_s9 }
  0x16   :  { %80 = vrot.lane.b32.xlu1 %v121_v14, %s151_s16 }
  0x18   :  { %74 = vrot.lane.b32.xlu0 %v120_v13, %s150_s15 }
  0x1a   :  { %92 = vrot.lane.b32.xlu1 %v123_v16, %s153_s22 }
  0x1c   :  { %86 = vrot.lane.b32.xlu0 %v122_v15, %s152_s21 }
  0x20   :  { %98 = vrot.lane.b32.xlu0 %v124_v17, %s154_s0 }
  0x74   :  { %v27_v19 = vpop.permute.xlu1 %26  }
  0x76   :  { %v12_v18 = vpop.permute.xlu0 %11  }
  0x77   :  { %15 = vst.msk [vmem:[#allocation0 + $0x1] sm:$0x1] %vm13_vm2, %v12_v18  }
  0x78   :  { %17 = vst.msk [vmem:[#allocation0] sm:$0x1] %vm16_vm3, %v12_v18   ;;  %v33_v21 = vpop.permute.xlu1 %32  }
  0x7a   :  { %v21_v20 = vpop.permute.xlu0 %20  }
  0x7b   :  { %23 = vst.msk [vmem:[#allocation0] sm:$0x1] %vm22_vm4, %v21_v20  }
  0x7c   :  { %29 = vst.msk [vmem:[#allocation0] sm:$0x1] %vm28_vm5, %v27_v19   ;;  %v45_v23 = vpop.permute.xlu1 %44  }
  0x7d   :  { %35 = vst.msk [vmem:[#allocation0] sm:$0x1] %vm34_vm6, %v33_v21  }
  0x7e   :  { %v39_v22 = vpop.permute.xlu0 %38  }
  0x7f   :  { %41 = vst.msk [vmem:[#allocation0] sm:$0x1] %vm40_vm7, %v39_v22  }
  0x80   :  { %47 = vst.msk [vmem:[#allocation0] sm:$0x1] %vm46_vm8, %v45_v23   ;;  %v57_v25 = vpop.permute.xlu1 %56  }
  0x82   :  { %v51_v24 = vpop.permute.xlu0 %50  }
  0x83   :  { %53 = vst.msk [vmem:[#allocation0] sm:$0x1] %vm52_vm9, %v51_v24  }
  0x84   :  { %59 = vst.msk [vmem:[#allocation0] sm:$0x1] %vm58_vm10, %v57_v25   ;;  %v69_v27 = vpop.permute.xlu1 %68  }
  0x86   :  { %v63_v26 = vpop.permute.xlu0 %62  }
  0x87   :  { %65 = vst.msk [vmem:[#allocation0] sm:$0x1] %vm64_vm11, %v63_v26  }
  0x88   :  { %71 = vst.msk [vmem:[#allocation0] sm:$0x1] %vm70_vm12, %v69_v27   ;;  %v81_v29 = vpop.permute.xlu1 %80  }
  0x8a   :  { %v75_v28 = vpop.permute.xlu0 %74  }
  0x8b   :  { %77 = vst.msk [vmem:[#allocation0] sm:$0x1] %vm76_vm13, %v75_v28  }
  0x8c   :  { %83 = vst.msk [vmem:[#allocation0] sm:$0x1] %vm82_vm14, %v81_v29   ;;  %v93_v31 = vpop.permute.xlu1 %92  }
  0x8e   :  { %v87_v30 = vpop.permute.xlu0 %86  }
  0x8f   :  { %89 = vst.msk [vmem:[#allocation0] sm:$0x1] %vm88_vm15, %v87_v30  }
  0x90   :  { %95 = vst.msk [vmem:[#allocation0] sm:$0x1] %vm94_vm0, %v93_v31  }
  0x92   :  { %v99_v32 = vpop.permute.xlu0 %98  }
  0x93   :  { %102 = vst.msk [vmem:[#allocation0 + $0x1] sm:$0x1] %vm100_vm1, %v99_v32  }
  0x9a   :  { %v106_v33 = vld [vmem:[#allocation0] sm:$0x3] }
  0x9b   :  { %108 = vst [vmem:[%s220_s1] sm:$0x3] %v106_v33 }

// kernel: neg.7
= control target key start
LH: loop header
LB: loop body
LE: loop exit
PB: predicated region body
PF: predicated region fallthrough
CT: control target
= control target key end

     0   :  { %s136_s0 = inlined_call_operand.vmem [shape: f32[144,4,4], index: 0, kind: input, shape index: {}]   ;;  %s137_s1 = inlined_call_operand.vmem [shape: f32[144,4,4], index: 1, kind: output, shape index: {}]  }
   0x1   :  { %v2_v0 = vld [vmem:[%s136_s0] sm:$0xf]  ;;  %v64_v1 = vld [vmem:[%s136_s0 + $0x8] sm:$0xf]  ;;  %v66_v2 = vld [vmem:[%s136_s0 + $0x10] sm:$0xf] }
   0x2   :  { %v5_v3 = vxor.u32 2147483648, %v2_v0  ;;  %v12_v4 = vxor.u32 2147483648, %v64_v1  ;;  %v20_v5 = vxor.u32 2147483648, %v66_v2  ;;  %v68_v6 = vld [vmem:[%s136_s0 + $0x18] sm:$0xf] }
   0x3   :  { %v28_v7 = vxor.u32 2147483648, %v68_v6  ;;  %v70_v8 = vld [vmem:[%s136_s0 + $0x4] sm:$0xf]  ;;  %v72_v9 = vld [vmem:[%s136_s0 + $0xc] sm:$0xf] }
   0x4   :  { %7 = vst [vmem:[%s137_s1] sm:$0xf] %v5_v3  ;;  %65 = vst [vmem:[%s137_s1 + $0x8] sm:$0xf] %v12_v4  ;;  %v36_v10 = vxor.u32 2147483648, %v70_v8  ;;  %v44_v11 = vxor.u32 2147483648, %v72_v9 }
   0x5   :  { %67 = vst [vmem:[%s137_s1 + $0x10] sm:$0xf] %v20_v5  ;;  %v74_v12 = vld [vmem:[%s136_s0 + $0x14] sm:$0xf]  ;;  %v76_v13 = vld [vmem:[%s136_s0 + $0x1c] sm:$0xf] }
   0x6   :  { %69 = vst [vmem:[%s137_s1 + $0x18] sm:$0xf] %v28_v7  ;;  %v52_v14 = vxor.u32 2147483648, %v74_v12  ;;  %v60_v15 = vxor.u32 2147483648, %v76_v13  ;;  %71 = vst [vmem:[%s137_s1 + $0x4] sm:$0xf] %v36_v10 }
   0x7   :  { %73 = vst [vmem:[%s137_s1 + $0xc] sm:$0xf] %v44_v11 }
   0x8   :  { %75 = vst [vmem:[%s137_s1 + $0x14] sm:$0xf] %v52_v14  ;;  %77 = vst [vmem:[%s137_s1 + $0x1c] sm:$0xf] %v60_v15 }

// kernel: custom-call.11
= control target key start
LH: loop header
LB: loop body
LE: loop exit
PB: predicated region body
PF: predicated region fallthrough
CT: control target
= control target key end

     0   :  { %5 = vsyncpa [#allocation3], 0  ;;  %s874_s0 = inlined_call_operand.vmem [shape: f32[144,8,8], index: 0, kind: input, shape index: {}]   ;;  %s875_s1 = inlined_call_operand.vmem [shape: f32[144,8,8], index: 1, kind: output, shape index: {0}]   ;;  %s876_s2 = inlined_call_operand.hbm [shape: s32[144,8], index: 2, kind: output, shape index: {1}]   ;;  %s877_s3 = inlined_call_operand.vmem [shape: s32[144,8], index: 3, kind: output, shape index: {2}]  }
   0x1   :  { %7 = vsyncpa [#allocation3 + $0x1], 0  ;;  %s696_s12 = smov 0   ;;  %s698_s13 = smov 0  }
   0x2   :  { %s700_s14 = smov 0   ;;  %s702_s15 = smov 0  }
   0x3 LB: > { %s717_s16 = sadd.s32 4294967295, %s668_s15   ;;  %s531_s17 = sadd.s32 4294967294, %s668_s15   ;;  %s668_s15 = sphi %s702_s15, %s883_s15   ;;  %s664_s14 = sphi %s700_s14, %s882_s14   ;;  %s660_s13 = sphi %s698_s13, %s881_s13   ;;  %s656_s12 = sphi %s696_s12, %s880_s12  }
   0x4   : > { %s721_s18 = sadd.s32 1, %s668_s15   ;;  %s17_s19 = sshrl.u32 %s668_s15, 3 }
   0x5   : > { %s18_s20 = sshrl.u32 %s721_s18, 3  ;;  %s22_s21 = sadd.s32 1, %s664_s14 }
   0x6   : > { %s19_s22 = ssub.s32 %s17_s19, %s18_s20  ;;  %p32_p0 = scmp.ne.s32.totalorder %s664_s14, %s660_s13 }
   0x7   : > { %p20_p1 = scmp.eq.s32.totalorder %s19_s22, 0  ;;  %p33_p2 = scmp.eq.s32.totalorder %s717_s16, 143 }
   0x8   : > { %p38_p3 = scmp.ne.s32.totalorder %s660_s13, %s656_s12  ;;  %p39_p4 = scmp.eq.s32.totalorder %s531_s17, 143 }
   0x9   : > { %s732_s23 = scalar_select %p20_p1, %s664_s14, %s22_s21  }
   0xa   : > { %p734_p5 = por %p33_p2, %p32_p0  ;;  %p738_p6 = por %p39_p4, %p38_p3 }
   0xb   : > { %p533_p7 = scmp.ge.s32.totalorder %s668_s15, 144 }
   0xc   : > { %s85_s26 = sand.u32 (!%p533_p7), 1, %s668_s15   ;;  %s535_s27 = sshll.u32 (!%p533_p7), %s668_s15, 3 }
   0xd   : > { %83 = sbr.rel (%p533_p7) target bundleno = 20 (0x14), region = 16  ;;  %s534_s28 = sshll.u32 (!%p533_p7), %s85_s26, 3 }
   0xe   : > { %s89_s4 = scalar_lea.vmem (!%p533_p7), %s874_s0, %s535_s27  ;;  %s87_s5 = scalar_lea.vmem (!%p533_p7), [#allocation0], %s534_s28 }
   0xf   : > { %v117_v0 = vld [vmem:[%s89_s4] sm:$0xff] (!%p533_p7) }
  0x10   : > { %118 = vst [vmem:[%s87_s5] sm:$0xff] (!%p533_p7), %v117_v0 }
  0x14 PF: > { %p536_p8 = scmp.ge.s32.totalorder %s668_s15, 1  ;;  %p123_p9 = scmp.lt.s32.totalorder %s668_s15, 145 }
  0x16   : > { %p124_p10 = pnand %p536_p8, %p123_p9 }
  0x18   : > { %127 = sbr.rel (%p124_p10) target bundleno = 433 (0x1b1), region = 54 }
  0x1f   : > { %s130_s6 = sand.u32 1, %s717_s16   ;;  %s145_s7 = sand.u32 1, %s660_s13   ;;  %v163_v1 = vlaneseq  ;;  %v674_v4 = vmov 0  }
  0x20   : > { %s537_s8 = sshll.u32 %s130_s6, 3  ;;  %s754_s9 = sshll.u32 %s145_s7, 3 }
  0x21   : > { %v757_v2 = vshrl.u32 %v163_v1, 7  ;;  %s132_s10 = scalar_lea.vmem [#allocation0], %s537_s8  ;;  %s759_s11 = scalar_lea.vmem [#allocation1], %s537_s8 }
  0x22   : > { %v156_v3 = vld [vmem:[%s132_s10] sm:$0xff]  ;;  %s158_s17 = sand.u32 7, %s717_s16   ;;  %s147_s19 = scalar_lea.vmem [#allocation2], %s754_s9 }
  0x23   : > { %157 = vst [vmem:[%s759_s11] sm:$0xff] %v156_v3  ;;  %167 = vst [vmem:[#allocation5] sm:$0xff] %v757_v2  ;;  %s767_s20 = scalar_lea.vmem %s147_s19, %s158_s17 [#allocation2]  ;;  %s153_s21 = scalar_lea.vmem [#allocation4], %s754_s9 }
  0x24   : > { %s772_s22 = scalar_lea.vmem %s153_s21, %s158_s17 [#allocation4]  ;;  %162 = vst [vmem:[%s767_s20] sm:$0x1] %v674_v4  ;;  %s775_s26 = smov 0  }
  0x25 LB: >> { %v782_v7 = vstv %s672_s26  ;;  %s224_s27 = ssub.s32 128, %s672_s26  ;;  %v230_v37 = vand.u32 127, %v163_v1  ;;  %s236_s28 = scalar_lea.vmem %s759_s11, %s672_s26 [#allocation1]  ;;  %s672_s26 = sphi %s775_s26, %s173_s26  }
  0x26   : >> { %vm182_vm0 = vcmp.ge.s32.totalorder %v757_v2, %v782_v7  ;;  %s242_s30 = scalar_lea.vmem [#allocation5], %s672_s26  ;;  %vm262_vm13 = vcmp.gt.s32.totalorder %v757_v2, %v782_v7  ;;  %s173_s26 = sadd.s32 1, %s672_s26  }
  0x27   : >> { %vm254_vm10 = vcmp.gt.s32.totalorder %v230_v37, %v782_v7  ;;  %vm231_vm11 = vcmp.eq.s32.totalorder %v230_v37, %v782_v7  ;;  %p170_p11 = scmp.ge.s32.totalorder %s173_s26, 8  }
  0x28   : >> { %vm266_vm15 = vmand %vm262_vm13, %vm231_vm11  ;;  %s545_s6 = sshll.u32 (%p170_p11), %s717_s16, 3  ;;  %s372_s8 = sshrl.u32 (%p170_p11), %s717_s16, 3 }
  0x29   : > { %s546_s26 = sshll.u32 (%p170_p11), %s372_s8, 7 }
  0x2a   : >> { %v178_v5 = vld [vmem:[%s759_s11] sm:$0xff]  ;;  %v238_v40 = vld [vmem:[%s236_s28] ss:$0 sm:$0xff] }
  0x2b   : >> { %v179_v6 = vand.u32 2147483647, %v178_v5  ;;  %v233_v39 = vld [vmem:[%s767_s20] ss:$0 sm:$0xff] }
  0x2c   : >> { %v244_v41 = vld [vmem:[%s242_s30] ss:$0 sm:$0xff] }
  0x2d   : >> { %vm541_vm1 = vcmp.gt.f32.partialorder %v179_v6, -inf }
  0x2e   : >> { %vm186_vm2 = vmand %vm182_vm0, %vm541_vm1 }
  0x2f   : >> { %v187_v8 = vsel %vm186_vm2, %v757_v2, %v782_v7  ;;  %v188_v9 = vsel %vm186_vm2, %v179_v6, -inf }
  0x30   : >> { %v189_v10 = vrot.slane %v188_v9, 1  ;;  %v190_v11 = vrot.slane %v187_v8, 1 }
  0x32   : >> { %vm191_vm3 = vcmp.ge.f32.partialorder %v189_v10, %v188_v9  ;;  %v194_v12 = vrot.slane %v189_v10, 1  ;;  %v195_v13 = vrot.slane %v190_v11, 1 }
  0x33   : >> { %v192_v14 = vsel %vm191_vm3, %v189_v10, %v188_v9  ;;  %v193_v15 = vsel %vm191_vm3, %v190_v11, %v187_v8 }
  0x34   : >> { %vm196_vm4 = vcmp.ge.f32.partialorder %v194_v12, %v192_v14  ;;  %v199_v16 = vrot.slane %v194_v12, 1  ;;  %v200_v17 = vrot.slane %v195_v13, 1 }
  0x35   : >> { %v197_v18 = vsel %vm196_vm4, %v194_v12, %v192_v14  ;;  %v198_v19 = vsel %vm196_vm4, %v195_v13, %v193_v15 }
  0x36   : >> { %vm201_vm5 = vcmp.ge.f32.partialorder %v199_v16, %v197_v18  ;;  %v204_v20 = vrot.slane %v199_v16, 1  ;;  %v205_v21 = vrot.slane %v200_v17, 1 }
  0x37   : >> { %v202_v22 = vsel %vm201_vm5, %v199_v16, %v197_v18  ;;  %v203_v23 = vsel %vm201_vm5, %v200_v17, %v198_v19 }
  0x38   : >> { %vm206_vm6 = vcmp.ge.f32.partialorder %v204_v20, %v202_v22  ;;  %v209_v24 = vrot.slane %v204_v20, 1  ;;  %v210_v25 = vrot.slane %v205_v21, 1 }
  0x39   : >> { %v207_v26 = vsel %vm206_vm6, %v204_v20, %v202_v22  ;;  %v208_v27 = vsel %vm206_vm6, %v205_v21, %v203_v23 }
  0x3a   : >> { %vm211_vm7 = vcmp.ge.f32.partialorder %v209_v24, %v207_v26  ;;  %v214_v28 = vrot.slane %v209_v24, 1  ;;  %v215_v29 = vrot.slane %v210_v25, 1 }
  0x3b   : >> { %v212_v30 = vsel %vm211_vm7, %v209_v24, %v207_v26  ;;  %v213_v31 = vsel %vm211_vm7, %v210_v25, %v208_v27 }
  0x3c   : >> { %vm216_vm8 = vcmp.ge.f32.partialorder %v214_v28, %v212_v30  ;;  %v219_v32 = vrot.slane %v214_v28, 1  ;;  %v220_v33 = vrot.slane %v215_v29, 1 }
  0x3d   : >> { %v217_v34 = vsel %vm216_vm8, %v214_v28, %v212_v30  ;;  %v218_v35 = vsel %vm216_vm8, %v215_v29, %v213_v31 }
  0x3e   : >> { %vm221_vm9 = vcmp.ge.f32.partialorder %v219_v32, %v217_v34 }
  0x3f   : >> { %v223_v36 = vsel %vm221_vm9, %v220_v33, %v218_v35 }
  0x40   : >> { %225 = vrot.lane.b32.xlu0 %v223_v36, %s224_s27  ;;  %s336_s27 = scalar_lea.vmem (%p170_p11), %s875_s1, %s545_s6  ;;  %s675_s6 = smov (%p170_p11), [#allocation2]  }
  0xb2   : >> { %v226_v38 = vpop.permute.xlu0 %225 }
  0xb3   : >> { %550 = vpush %v226_v38 }
  0xe4   : >> { %s551_s29 = spop %550 }
  0xe5   : >> { %v232_v42 = vstv %s551_s29  ;;  %s237_s4 = scalar_lea.vmem %s759_s11, %s551_s29 [#allocation1]  ;;  %s243_s5 = scalar_lea.vmem [#allocation5], %s551_s29 }
  0xe6   : >> { %v239_v43 = vld [vmem:[%s237_s4] ss:$0 sm:$0xff]  ;;  %v234_v45 = vsel %vm231_vm11, %v232_v42, %v233_v39 }
  0xe7   : >> { %v245_v44 = vld [vmem:[%s243_s5] ss:$0 sm:$0xff]  ;;  %240 = vst [vmem:[%s237_s4] sm:$0x1] %v238_v40  ;;  %vm248_vm12 = vcmp.ne.f32.partialorder %v239_v43, 0.0  ;;  %235 = vst [vmem:[%s767_s20] sm:$0x1] %v234_v45  ;;  %v255_v52 = vsel %vm254_vm10, %v239_v43, 0.0 }
  0xe8   : >> { %246 = vst [vmem:[%s243_s5] sm:$0x1] %v244_v41  ;;  %241 = vst [vmem:[%s236_s28] sm:$0x1] %v239_v43  ;;  %s379_s20 = sshll.u32 (%p170_p11), %s147_s19, 4  ;;  %s327_s4 = scalar_lea.sflag (%p170_p11), [#allocation3], %s145_s7  ;;  %s380_s20 = int_to_ptr.vmem [resolvable:$true] %s379_s20 }
  0xe9   : >> { %247 = vst [vmem:[%s242_s30] sm:$0x1] %v245_v44  ;;  %vm249_vm14 = vmand %vm231_vm11, %vm248_vm12  ;;  %s826_s30 = scalar_lea.hbm (%p170_p11), %s876_s2, %s546_s26  ;;  %s602_s5 = scalar_lea.vmem (%p170_p11), %s380_s20, 128 }
  0xea   : >> { %v250_v46 = vsel %vm249_vm14, %v239_v43, 1.0  ;;  %p603_p12 = scmp.ne.s32.totalorder (%p170_p11), %s380_s20, %s602_s5 }
  0xeb   : >> { %v263_v47 = vsel %vm262_vm13, %v250_v46, 1.0 }
  0xec   : >> { %600 = vrcp.f32 %v263_v47  ;;  %p604_p13 = pnand (%p170_p11), %p603_p12, %p734_p5 }
  0xee   : > { %p605_p0 = pneg (%p170_p11), %p604_p13 }
  0xef   : >> { %v259_v49 = vld [vmem:[%s759_s11] sm:$0xff] }
  0xf0   : > { %v273_v56 = vld [vmem:[#allocation5] sm:$0xff] (%p170_p11) }
  0xf6   : >> { %v601_v48 = vpop.eup %600 }
  0xf7   : >> { %v265_v50 = vmul.f32 %v601_v48, %v259_v49 }
  0xf9   : >> { %v267_v51 = vsel %vm266_vm15, %v265_v50, 0.0 }
  0xfa   : >> { %268 = vadd.xlane.f32.xlu0 %v267_v51 }
 0x127   : > { %289 = vxpose.xlu0.b32.start.end [1/1] (short) (narrow) (%p170_p11), %v273_v56, 8 }
 0x186   : > { %172 = sbr.rel (!%p170_p11) target bundleno = 37 (0x25), region = 214 }
 0x187   : >> { %v269_v53 = vpop.xlane.xlu0 %268 }
 0x188   : >> { %v270_v54 = vmul.f32 %v269_v53, %v255_v52 }
 0x18a   : >> { %v271_v55 = vsub.f32 %v265_v50, %v270_v54 }
 0x18c   : >> { %272 = vst [vmem:[%s759_s11] sm:$0xff] %v271_v55 }
 0x193   : > { %v364_v57 = vld [vmem:[%s759_s11] sm:$0xff]  ;;  %s606_s11 = sshll.u32 %s675_s6, 4  ;;  %s607_s11 = int_to_ptr.vmem [resolvable:$false] %s606_s11 }
 0x194   : > { %365 = vst [vmem:[%s336_s27] sm:$0xff] %v364_v57  ;;  %s608_s10 = scalar_lea.vmem %s607_s11, 256  ;;  %p609_p1 = scmp.lt.s32.totalorder %s380_s20, %s607_s11 }
 0x195   : > { %p610_p2 = scmp.lt.s32.totalorder %s608_s10, %s602_s5 }
 0x197   : > { %p611_p3 = por %p610_p2, %p609_p1 }
 0x199   : > { %p612_p4 = pnand %p611_p3, %p605_p0 }
 0x19b   : > { %615 = shalt.err (!%p612_p4)
}
 0x19c   : > { %s616_s7 = scalar_lea.hbm %s826_s30, 128  ;;  %s620_s27 = scalar_lea.hbm %s876_s2, 2304 }
 0x19d   : > { %p617_p7 = scmp.ne.s32.totalorder %s826_s30, %s616_s7  ;;  %p621_p10 = scmp.lt.u32.totalorder %s826_s30, %s876_s2 }
 0x19e   : > { %p622_p11 = scmp.lt.u32.totalorder %s620_s27, %s616_s7  ;;  %p624_p13 = scmp.lt.u32.totalorder %s616_s7, %s826_s30 }
 0x19f   : > { %p618_p8 = pnand %p617_p7, %p734_p5 }
 0x1a0   : > { %p623_p12 = por %p622_p11, %p621_p10 }
 0x1a1   : > { %p619_p9 = pneg %p618_p8 }
 0x1a2   : > { %p625_p0 = por %p624_p13, %p623_p12 }
 0x1a4   : > { %p626_p1 = pnand %p625_p0, %p619_p9 }
 0x1a6   : > { %629 = shalt.err (!%p626_p1)
}
 0x1a7   : > { %552 = dma.vmem_to_hbm [thread:$0]  (%p734_p5), %s380_s20, 128, %s826_s30, %s327_s4   ;;  %v305_v58 = vpop.trf.xlu0 }
 0x1a8   : > { %321 = vst [vmem:[%s772_s22] sm:$0x1] %v305_v58  ;;  %385 = sbr.rel (!%p734_p5) target bundleno = 433 (0x1b1), region = 104  ;;  %s547_s29 = sshll.u32 (%p734_p5), %s372_s8, 3 }
 0x1a9   : > { %s388_s11 = scalar_lea.vmem (%p734_p5), %s877_s3, %s547_s29 }
 0x1af   : > { %v416_v59 = vld [vmem:[%s153_s21] sm:$0xff] }
 0x1b0   : > { %417 = vst [vmem:[%s388_s11] sm:$0xff] %v416_v59 }
 0x1b1 PF: > { %p558_p2 = scmp.ge.s32.totalorder %s668_s15, 2  ;;  %s433_s22 = sand.u32 1, %s656_s12  }
 0x1b2   : > { %s434_s24 = scalar_lea.sflag [#allocation3], %s433_s22 }
 0x1b3   : > { %p555_p5 = pnand %p558_p2, %p738_p6 }
 0x1b5   : > { %651 = dma.done.wait (!%p555_p5), %s434_s24, 128  }
 0x1b6   : > { %653 = vsyncadd (!%p555_p5), %s434_s24, 4294967168  ;;  %p10_p3 = scmp.ge.s32.totalorder %s721_s18, 146   ;;  %s880_s12 = smov %s660_s13 }
 0x1b7   : > { %s881_s13 = smov %s664_s14  ;;  %s882_s14 = smov %s732_s23 }
 0x1b8   : > { %s883_s15 = smov %s721_s18  ;;  %12 = sbr.rel (!%p10_p3) target bundleno = 3 (0x3), region = 225 }
 0x1bf   :  { %446 = vsyncpa [#allocation3], 1 }
 0x1c0   :  { %448 = vsyncpa [#allocation3 + $0x1], 1 }

// kernel: custom-call.13
= control target key start
LH: loop header
LB: loop body
LE: loop exit
PB: predicated region body
PF: predicated region fallthrough
CT: control target
= control target key end

     0   :  { %s692_s6 = smov 0   ;;  %s694_s7 = smov 0   ;;  %s786_s0 = inlined_call_operand.vmem [shape: f32[144,1,8,8], index: 0, kind: input, shape index: {}]   ;;  %s787_s1 = inlined_call_operand.vmem [shape: f32[144,1,8,8], index: 1, kind: output, shape index: {}]  }
   0x1   :  { %s696_s8 = smov 0  }
   0x2 LB: > { %s524_s9 = sadd.s32 4294967295, %s662_s8   ;;  %s22_s10 = sadd.s32 1, %s658_s7  ;;  %s662_s8 = sphi %s696_s8, %s7_s8   ;;  %s658_s7 = sphi %s694_s7, %s789_s7   ;;  %s654_s6 = sphi %s692_s6, %s788_s6  }
   0x3   : > { %p23_p0 = scmp.ge.s32.totalorder %s22_s10, 2  ;;  %p526_p1 = scmp.ge.s32.totalorder %s662_s8, 2 }
   0x4   : > { %s49_s11 = sand.u32 (!%p526_p1), 1, %s662_s8   ;;  %s528_s12 = sshll.u32 (!%p526_p1), %s658_s7, 3 }
   0x5   : > { %s791_s10 = smov (%p23_p0, %s22_s10), 0  ;;  %47 = sbr.rel (%p526_p1) target bundleno = 12 (0xc), region = 16 }
   0x6   : > { %s527_s13 = sshll.u32 (!%p526_p1), %s49_s11, 6  ;;  %s59_s16 = scalar_lea.vmem (!%p526_p1), %s786_s0, %s528_s12 }
   0x7   : > { %v101_v0 = vld [vmem:[%s59_s16] sm:$0xff] (!%p526_p1)  ;;  %v103_v1 = vld [vmem:[%s59_s16 + $0x10] sm:$0xff] (!%p526_p1)  ;;  %s51_s17 = scalar_lea.vmem (!%p526_p1), [#allocation0], %s527_s13 }
   0x8   : > { %v105_v2 = vld [vmem:[%s59_s16 + $0x20] sm:$0xff] (!%p526_p1)  ;;  %102 = vst [vmem:[%s51_s17] sm:$0xff] (!%p526_p1), %v101_v0  ;;  %104 = vst [vmem:[%s51_s17 + $0x8] sm:$0xff] (!%p526_p1), %v103_v1  ;;  %v107_v3 = vld [vmem:[%s59_s16 + $0x30] sm:$0xff] (!%p526_p1) }
   0x9   : > { %106 = vst [vmem:[%s51_s17 + $0x10] sm:$0xff] (!%p526_p1), %v105_v2  ;;  %v109_v4 = vld [vmem:[%s59_s16 + $0x40] sm:$0xff] (!%p526_p1)  ;;  %v111_v5 = vld [vmem:[%s59_s16 + $0x50] sm:$0xff] (!%p526_p1)  ;;  %108 = vst [vmem:[%s51_s17 + $0x18] sm:$0xff] (!%p526_p1), %v107_v3 }
   0xa   : > { %110 = vst [vmem:[%s51_s17 + $0x20] sm:$0xff] (!%p526_p1), %v109_v4  ;;  %112 = vst [vmem:[%s51_s17 + $0x28] sm:$0xff] (!%p526_p1), %v111_v5  ;;  %v113_v6 = vld [vmem:[%s59_s16 + $0x60] sm:$0xff] (!%p526_p1)  ;;  %v115_v7 = vld [vmem:[%s59_s16 + $0x70] sm:$0xff] (!%p526_p1) }
   0xb   : > { %114 = vst [vmem:[%s51_s17 + $0x30] sm:$0xff] (!%p526_p1), %v113_v6  ;;  %116 = vst [vmem:[%s51_s17 + $0x38] sm:$0xff] (!%p526_p1), %v115_v7 }
   0xc PF: > { %p529_p2 = scmp.ge.s32.totalorder %s662_s8, 1  ;;  %p121_p3 = scmp.lt.s32.totalorder %s662_s8, 3 }
   0xe   : > { %p122_p4 = pnand %p529_p2, %p121_p3 }
  0x10   : > { %125 = sbr.rel (%p122_p4) target bundleno = 257 (0x101), region = 54 }
  0x17   : > { %s128_s18 = sand.u32 1, %s524_s9   ;;  %s664_s22 = smov 0  }
  0x18   : > { %s530_s19 = sshll.u32 %s128_s18, 6 }
  0x19   : > { %s130_s20 = scalar_lea.vmem [#allocation0], %s530_s19  ;;  %s721_s21 = scalar_lea.vmem [#allocation1], %s530_s19 }
  0x1a LB: >> { %s532_s23 = sshll.u32 %s666_s22, 3  ;;  %v155_v8 = vlaneseq  ;;  %s149_s26 = scalar_lea.vmem [#allocation3], %s666_s22  ;;  %v158_v11 = vstv %s666_s22  ;;  %s666_s22 = sphi %s664_s22, %s144_s22  }
  0x1b   : >> { %s146_s24 = sadd.s32 %s666_s22, %s532_s23  ;;  %s152_s27 = scalar_lea.vmem %s130_s20, %s532_s23 [#allocation0] }
  0x1c   : >> { %s147_s25 = scalar_lea.vmem %s130_s20, %s146_s24 [#allocation0]  ;;  %v156_v10 = vshrl.u32 %v155_v8, 7  ;;  %v154_v12 = vld [vmem:[%s152_s27] sm:$0xff]  ;;  %s153_s28 = scalar_lea.vmem [#allocation2], %s532_s23 }
  0x1d   : >> { %v148_v9 = vld [vmem:[%s147_s25] ss:$0 sm:$0xff]  ;;  %s144_s22 = sadd.s32 1, %s666_s22  }
  0x1e   : >> { %150 = vst [vmem:[%s149_s26] sm:$0x1] %v148_v9  ;;  %620 = vrcp.f32 %v148_v9  ;;  %vm159_vm0 = vcmp.ge.s32.totalorder %v158_v11, %v156_v10  ;;  %p141_p5 = scmp.ge.s32.totalorder %s144_s22, 8  }
  0x1f   : >> { %v162_v13 = vsel %vm159_vm0, %v154_v12, 0.0  ;;  %s668_s29 = smov (%p141_p5), 0  }
  0x27   : > { %143 = sbr.rel (!%p141_p5) target bundleno = 26 (0x1a), region = 176 }
  0x28   : >> { %v621_v14 = vpop.eup %620 }
  0x29   : >> { %v164_v15 = vmul.f32 %v621_v14, %v162_v13 }
  0x2b   : >> { %v165_v16 = vxor.u32 2147483648, %v164_v15 }
  0x2d   : >> { %166 = vst [vmem:[%s153_s28] sm:$0xff] %v165_v16 }
  0x2e LB: >> { %v173_v17 = vstv %s670_s29  ;;  %s534_s30 = sshll.u32 %s670_s29, 3  ;;  %v680_v18 = vmov 0.0   ;;  %s172_s29 = sadd.s32 1, %s670_s29   ;;  %s670_s29 = sphi %s668_s29, %s172_s29  }
  0x2f   : >> { %vm177_vm1 = vcmp.eq.s32.totalorder %v173_v17, %v156_v10  ;;  %s179_s2 = scalar_lea.vmem %s721_s21, %s534_s30 [#allocation1]  ;;  %p169_p6 = scmp.ge.s32.totalorder %s172_s29, 8  }
  0x30   : >> { %v180_v19 = vsel %vm177_vm1, -1.0, %v680_v18  ;;  %v681_v20 = vmov (%p169_p6), 1.0   ;;  %s725_s3 = smov (%p169_p6), 1  }
  0x31   : >> { %181 = vst [vmem:[%s179_s2] sm:$0xff] %v180_v19  ;;  %171 = sbr.rel (!%p169_p6) target bundleno = 46 (0x2e), region = 187 }
  0x32   : > { %182 = vst [vmem:[%s721_s21] sm:$0x1] (%p169_p6), %v681_v20 }
  0x38 LB: >> { %s535_s4 = sshll.u32 %s674_s3, 3  ;;  %s737_s9 = scalar_lea.vmem %s721_s21, %s674_s3 [#allocation1]  ;;  %s674_s3 = sphi %s725_s3, %s188_s3  }
  0x39   : >> { %v192_v21 = vld [vmem:[%s721_s21] sm:$0xff]  ;;  %s190_s5 = scalar_lea.vmem [#allocation2], %s535_s4  ;;  %s188_s3 = sadd.s32 1, %s674_s3  }
  0x3a   : >> { %v732_v22 = vld [vmem:[%s190_s5] sm:$0xff]  ;;  %p185_p7 = scmp.ge.s32.totalorder %s188_s3, 8  }
  0x3b   : >> { %v193_v23 = vmul.f32 %v192_v21, %v732_v22  ;;  %s676_s11 = smov (%p185_p7), 0  }
  0x3d   : >> { %v195_v24 = vrot.slane %v193_v23, 4 }
  0x3f   : >> { %v196_v25 = vadd.f32 %v195_v24, %v193_v23 }
  0x41   : >> { %v197_v26 = vrot.slane %v196_v25, 2 }
  0x43   : >> { %v198_v27 = vadd.f32 %v197_v26, %v196_v25 }
  0x45   : >> { %v199_v28 = vrot.slane %v198_v27, 1 }
  0x47   : >> { %v200_v29 = vadd.f32 %v199_v28, %v198_v27 }
  0x49   : >> { %201 = vst [vmem:[%s737_s9] sm:$0x1] %v200_v29 }
  0x50   : >> { %v537_v30 = vld [vmem:[%s721_s21 + $0x8] sm:$0xff] }
  0x51   : >> { %v207_v31 = vmul.f32 %v537_v30, %v732_v22 }
  0x53   : >> { %v210_v32 = vrot.slane %v207_v31, 4 }
  0x55   : >> { %v211_v33 = vadd.f32 %v210_v32, %v207_v31 }
  0x57   : >> { %v212_v34 = vrot.slane %v211_v33, 2 }
  0x59   : >> { %v213_v35 = vadd.f32 %v212_v34, %v211_v33 }
  0x5b   : >> { %v214_v36 = vrot.slane %v213_v35, 1 }
  0x5d   : >> { %v215_v37 = vadd.f32 %v214_v36, %v213_v35 }
  0x5f   : >> { %538 = vst [vmem:[%s737_s9 + $0x8] sm:$0x1] %v215_v37 }
  0x66   : >> { %v540_v38 = vld [vmem:[%s721_s21 + $0x10] sm:$0xff] }
  0x67   : >> { %v222_v39 = vmul.f32 %v540_v38, %v732_v22 }
  0x69   : >> { %v225_v40 = vrot.slane %v222_v39, 4 }
  0x6b   : >> { %v226_v41 = vadd.f32 %v225_v40, %v222_v39 }
  0x6d   : >> { %v227_v42 = vrot.slane %v226_v41, 2 }
  0x6f   : >> { %v228_v43 = vadd.f32 %v227_v42, %v226_v41 }
  0x71   : >> { %v229_v44 = vrot.slane %v228_v43, 1 }
  0x73   : >> { %v230_v45 = vadd.f32 %v229_v44, %v228_v43 }
  0x75   : >> { %541 = vst [vmem:[%s737_s9 + $0x10] sm:$0x1] %v230_v45 }
  0x7c   : >> { %v543_v46 = vld [vmem:[%s721_s21 + $0x18] sm:$0xff] }
  0x7d   : >> { %v237_v47 = vmul.f32 %v543_v46, %v732_v22 }
  0x7f   : >> { %v240_v48 = vrot.slane %v237_v47, 4 }
  0x81   : >> { %v241_v49 = vadd.f32 %v240_v48, %v237_v47 }
  0x83   : >> { %v242_v50 = vrot.slane %v241_v49, 2 }
  0x85   : >> { %v243_v51 = vadd.f32 %v242_v50, %v241_v49 }
  0x87   : >> { %v244_v52 = vrot.slane %v243_v51, 1 }
  0x89   : >> { %v245_v53 = vadd.f32 %v244_v52, %v243_v51 }
  0x8b   : >> { %544 = vst [vmem:[%s737_s9 + $0x18] sm:$0x1] %v245_v53 }
  0x92   : >> { %v546_v54 = vld [vmem:[%s721_s21 + $0x20] sm:$0xff] }
  0x93   : >> { %v252_v55 = vmul.f32 %v546_v54, %v732_v22 }
  0x95   : >> { %v255_v56 = vrot.slane %v252_v55, 4 }
  0x97   : >> { %v256_v57 = vadd.f32 %v255_v56, %v252_v55 }
  0x99   : >> { %v257_v58 = vrot.slane %v256_v57, 2 }
  0x9b   : >> { %v258_v59 = vadd.f32 %v257_v58, %v256_v57 }
  0x9d   : >> { %v259_v60 = vrot.slane %v258_v59, 1 }
  0x9f   : >> { %v260_v61 = vadd.f32 %v259_v60, %v258_v59 }
  0xa1   : >> { %547 = vst [vmem:[%s737_s9 + $0x20] sm:$0x1] %v260_v61 }
  0xa8   : >> { %v549_v62 = vld [vmem:[%s721_s21 + $0x28] sm:$0xff] }
  0xa9   : >> { %v267_v63 = vmul.f32 %v549_v62, %v732_v22 }
  0xab   : >> { %v270_v0 = vrot.slane %v267_v63, 4 }
  0xad   : >> { %v271_v1 = vadd.f32 %v270_v0, %v267_v63 }
  0xaf   : >> { %v272_v2 = vrot.slane %v271_v1, 2 }
  0xb1   : >> { %v273_v3 = vadd.f32 %v272_v2, %v271_v1 }
  0xb3   : >> { %v274_v4 = vrot.slane %v273_v3, 1 }
  0xb5   : >> { %v275_v5 = vadd.f32 %v274_v4, %v273_v3 }
  0xb7   : >> { %550 = vst [vmem:[%s737_s9 + $0x28] sm:$0x1] %v275_v5 }
  0xbe   : >> { %v552_v6 = vld [vmem:[%s721_s21 + $0x30] sm:$0xff] }
  0xbf   : >> { %v282_v7 = vmul.f32 %v552_v6, %v732_v22 }
  0xc1   : >> { %v285_v8 = vrot.slane %v282_v7, 4 }
  0xc3   : >> { %v286_v9 = vadd.f32 %v285_v8, %v282_v7 }
  0xc5   : >> { %v287_v10 = vrot.slane %v286_v9, 2 }
  0xc7   : >> { %v288_v11 = vadd.f32 %v287_v10, %v286_v9 }
  0xc9   : >> { %v289_v12 = vrot.slane %v288_v11, 1 }
  0xcb   : >> { %v290_v13 = vadd.f32 %v289_v12, %v288_v11 }
  0xcd   : >> { %553 = vst [vmem:[%s737_s9 + $0x30] sm:$0x1] %v290_v13 }
  0xd4   : >> { %v555_v14 = vld [vmem:[%s721_s21 + $0x38] sm:$0xff] }
  0xd5   : >> { %v297_v15 = vmul.f32 %v555_v14, %v732_v22 }
  0xd7   : >> { %v300_v16 = vrot.slane %v297_v15, 4 }
  0xd9   : >> { %v301_v17 = vadd.f32 %v300_v16, %v297_v15 }
  0xdb   : >> { %v302_v18 = vrot.slane %v301_v17, 2 }
  0xdd   : >> { %v303_v19 = vadd.f32 %v302_v18, %v301_v17  ;;  %187 = sbr.rel (!%p185_p7) target bundleno = 56 (0x38), region = 198 }
  0xdf   : >> { %v304_v20 = vrot.slane %v303_v19, 1 }
  0xe1   : >> { %v305_v21 = vadd.f32 %v304_v20, %v303_v19 }
  0xe3   : >> { %556 = vst [vmem:[%s737_s9 + $0x38] sm:$0x1] %v305_v21 }
  0xe4 LB: >> { %s313_s12 = scalar_lea.vmem [#allocation3], %s678_s11  ;;  %s557_s13 = sshll.u32 %s678_s11, 3  ;;  %s678_s11 = sphi %s676_s11, %s312_s11  }
  0xe5   : >> { %v314_v22 = vld [vmem:[%s313_s12] ss:$0 sm:$0xff]  ;;  %s316_s14 = scalar_lea.vmem %s721_s21, %s557_s13 [#allocation1]  ;;  %s312_s11 = sadd.s32 1, %s678_s11  }
  0xe6   : >> { %622 = vrcp.f32 %v314_v22  ;;  %vm320_vm2 = vweird.f32 %v314_v22  ;;  %p309_p8 = scmp.ge.s32.totalorder %s312_s11, 8  }
  0xe7   : > { %s559_s15 = sshll.u32 (%p309_p8), %s654_s6, 3 }
  0xe8   : > { %s334_s18 = scalar_lea.vmem (%p309_p8), %s787_s1, %s559_s15 }
  0xea   : >> { %v317_v23 = vld [vmem:[%s316_s14] sm:$0xff] }
  0xee   : > { %311 = sbr.rel (!%p309_p8) target bundleno = 228 (0xe4), region = 209 }
  0xf0   : >> { %v623_v24 = vpop.eup %622 }
  0xf1   : >> { %v319_v25 = vmul.f32 %v623_v24, %v317_v23 }
  0xf3   : >> { %v321_v26 = vsel %vm320_vm2, %v317_v23, %v319_v25 }
  0xf4   : >> { %322 = vst [vmem:[%s316_s14] sm:$0xff] %v321_v26 }
  0xfb   : > { %v376_v27 = vld [vmem:[%s721_s21] sm:$0xff]  ;;  %v378_v28 = vld [vmem:[%s721_s21 + $0x8] sm:$0xff]  ;;  %v380_v29 = vld [vmem:[%s721_s21 + $0x10] sm:$0xff] }
  0xfc   : > { %v382_v30 = vld [vmem:[%s721_s21 + $0x18] sm:$0xff]  ;;  %v384_v31 = vld [vmem:[%s721_s21 + $0x20] sm:$0xff]  ;;  %v386_v32 = vld [vmem:[%s721_s21 + $0x28] sm:$0xff]  ;;  %377 = vst [vmem:[%s334_s18] sm:$0xff] %v376_v27 }
  0xfd   : > { %379 = vst [vmem:[%s334_s18 + $0x10] sm:$0xff] %v378_v28  ;;  %381 = vst [vmem:[%s334_s18 + $0x20] sm:$0xff] %v380_v29  ;;  %v388_v33 = vld [vmem:[%s721_s21 + $0x30] sm:$0xff]  ;;  %v390_v34 = vld [vmem:[%s721_s21 + $0x38] sm:$0xff] }
  0xfe   : > { %383 = vst [vmem:[%s334_s18 + $0x30] sm:$0xff] %v382_v30  ;;  %385 = vst [vmem:[%s334_s18 + $0x40] sm:$0xff] %v384_v31 }
  0xff   : > { %387 = vst [vmem:[%s334_s18 + $0x50] sm:$0xff] %v386_v32  ;;  %389 = vst [vmem:[%s334_s18 + $0x60] sm:$0xff] %v388_v33 }
 0x100   : > { %391 = vst [vmem:[%s334_s18 + $0x70] sm:$0xff] %v390_v34 }
 0x101 PF: > { %s7_s8 = sadd.s32 1, %s662_s8   ;;  %s788_s6 = smov %s658_s7 }
 0x102   : > { %p4_p9 = scmp.ge.s32.totalorder %s7_s8, 4   ;;  %s789_s7 = smov %s791_s10 }
 0x104   :  { %6 = sbr.rel (!%p4_p9) target bundleno = 2 (0x2), region = 220 }

// kernel: custom-call.12
= control target key start
LH: loop header
LB: loop body
LE: loop exit
PB: predicated region body
PF: predicated region fallthrough
CT: control target
= control target key end

     0   :  { %s695_s6 = smov 0   ;;  %s697_s7 = smov 0   ;;  %s788_s0 = inlined_call_operand.vmem [shape: f32[144,1,8,8], index: 0, kind: input, shape index: {}]   ;;  %s789_s1 = inlined_call_operand.vmem [shape: f32[144,1,8,8], index: 1, kind: output, shape index: {}]  }
   0x1   :  { %s699_s8 = smov 0  }
   0x2 LB: > { %s526_s9 = sadd.s32 4294967295, %s665_s8   ;;  %s22_s10 = sadd.s32 1, %s661_s7  ;;  %s665_s8 = sphi %s699_s8, %s7_s8   ;;  %s661_s7 = sphi %s697_s7, %s791_s7   ;;  %s657_s6 = sphi %s695_s6, %s790_s6  }
   0x3   : > { %p23_p0 = scmp.ge.s32.totalorder %s22_s10, 2  ;;  %p528_p1 = scmp.ge.s32.totalorder %s665_s8, 2 }
   0x4   : > { %s49_s11 = sand.u32 (!%p528_p1), 1, %s665_s8   ;;  %s530_s12 = sshll.u32 (!%p528_p1), %s661_s7, 3 }
   0x5   : > { %s793_s10 = smov (%p23_p0, %s22_s10), 0  ;;  %47 = sbr.rel (%p528_p1) target bundleno = 12 (0xc), region = 16 }
   0x6   : > { %s529_s13 = sshll.u32 (!%p528_p1), %s49_s11, 6  ;;  %s59_s16 = scalar_lea.vmem (!%p528_p1), %s788_s0, %s530_s12 }
   0x7   : > { %v101_v0 = vld [vmem:[%s59_s16] sm:$0xff] (!%p528_p1)  ;;  %v103_v1 = vld [vmem:[%s59_s16 + $0x10] sm:$0xff] (!%p528_p1)  ;;  %s51_s17 = scalar_lea.vmem (!%p528_p1), [#allocation0], %s529_s13 }
   0x8   : > { %v105_v2 = vld [vmem:[%s59_s16 + $0x20] sm:$0xff] (!%p528_p1)  ;;  %102 = vst [vmem:[%s51_s17] sm:$0xff] (!%p528_p1), %v101_v0  ;;  %104 = vst [vmem:[%s51_s17 + $0x8] sm:$0xff] (!%p528_p1), %v103_v1  ;;  %v107_v3 = vld [vmem:[%s59_s16 + $0x30] sm:$0xff] (!%p528_p1) }
   0x9   : > { %106 = vst [vmem:[%s51_s17 + $0x10] sm:$0xff] (!%p528_p1), %v105_v2  ;;  %v109_v4 = vld [vmem:[%s59_s16 + $0x40] sm:$0xff] (!%p528_p1)  ;;  %v111_v5 = vld [vmem:[%s59_s16 + $0x50] sm:$0xff] (!%p528_p1)  ;;  %108 = vst [vmem:[%s51_s17 + $0x18] sm:$0xff] (!%p528_p1), %v107_v3 }
   0xa   : > { %110 = vst [vmem:[%s51_s17 + $0x20] sm:$0xff] (!%p528_p1), %v109_v4  ;;  %112 = vst [vmem:[%s51_s17 + $0x28] sm:$0xff] (!%p528_p1), %v111_v5  ;;  %v113_v6 = vld [vmem:[%s59_s16 + $0x60] sm:$0xff] (!%p528_p1)  ;;  %v115_v7 = vld [vmem:[%s59_s16 + $0x70] sm:$0xff] (!%p528_p1) }
   0xb   : > { %114 = vst [vmem:[%s51_s17 + $0x30] sm:$0xff] (!%p528_p1), %v113_v6  ;;  %116 = vst [vmem:[%s51_s17 + $0x38] sm:$0xff] (!%p528_p1), %v115_v7 }
   0xc PF: > { %p531_p2 = scmp.ge.s32.totalorder %s665_s8, 1  ;;  %p121_p3 = scmp.lt.s32.totalorder %s665_s8, 3 }
   0xe   : > { %p122_p4 = pnand %p531_p2, %p121_p3 }
  0x10   : > { %125 = sbr.rel (%p122_p4) target bundleno = 258 (0x102), region = 54 }
  0x17   : > { %s128_s18 = sand.u32 1, %s526_s9   ;;  %s667_s22 = smov 0  }
  0x18   : > { %s532_s19 = sshll.u32 %s128_s18, 6 }
  0x19   : > { %s130_s20 = scalar_lea.vmem [#allocation0], %s532_s19  ;;  %s724_s21 = scalar_lea.vmem [#allocation1], %s532_s19 }
  0x1a LB: >> { %s534_s23 = sshll.u32 %s669_s22, 3  ;;  %v155_v8 = vlaneseq  ;;  %s149_s26 = scalar_lea.vmem [#allocation3], %s669_s22  ;;  %v158_v11 = vstv %s669_s22  ;;  %s669_s22 = sphi %s667_s22, %s144_s22  }
  0x1b   : >> { %s146_s24 = sadd.s32 %s669_s22, %s534_s23  ;;  %s152_s27 = scalar_lea.vmem %s130_s20, %s534_s23 [#allocation0] }
  0x1c   : >> { %s147_s25 = scalar_lea.vmem %s130_s20, %s146_s24 [#allocation0]  ;;  %v156_v10 = vshrl.u32 %v155_v8, 7  ;;  %v154_v12 = vld [vmem:[%s152_s27] sm:$0xff]  ;;  %s153_s28 = scalar_lea.vmem [#allocation2], %s534_s23 }
  0x1d   : >> { %v148_v9 = vld [vmem:[%s147_s25] ss:$0 sm:$0xff]  ;;  %s144_s22 = sadd.s32 1, %s669_s22  }
  0x1e   : >> { %150 = vst [vmem:[%s149_s26] sm:$0x1] %v148_v9  ;;  %623 = vrcp.f32 %v148_v9  ;;  %vm159_vm0 = vcmp.le.s32.totalorder %v158_v11, %v156_v10  ;;  %p141_p5 = scmp.ge.s32.totalorder %s144_s22, 8  }
  0x1f   : >> { %v162_v13 = vsel %vm159_vm0, %v154_v12, 0.0  ;;  %s671_s29 = smov (%p141_p5), 0  }
  0x27   : > { %143 = sbr.rel (!%p141_p5) target bundleno = 26 (0x1a), region = 177 }
  0x28   : >> { %v624_v14 = vpop.eup %623 }
  0x29   : >> { %v164_v15 = vmul.f32 %v624_v14, %v162_v13 }
  0x2b   : >> { %v165_v16 = vxor.u32 2147483648, %v164_v15 }
  0x2d   : >> { %166 = vst [vmem:[%s153_s28] sm:$0xff] %v165_v16 }
  0x2e LB: >> { %v173_v17 = vstv %s673_s29  ;;  %s536_s30 = sshll.u32 %s673_s29, 3  ;;  %v683_v18 = vmov 0.0   ;;  %s172_s29 = sadd.s32 1, %s673_s29   ;;  %s673_s29 = sphi %s671_s29, %s172_s29  }
  0x2f   : >> { %vm177_vm1 = vcmp.eq.s32.totalorder %v173_v17, %v156_v10  ;;  %s179_s2 = scalar_lea.vmem %s724_s21, %s536_s30 [#allocation1]  ;;  %p169_p6 = scmp.ge.s32.totalorder %s172_s29, 8  }
  0x30   : >> { %v180_v19 = vsel %vm177_vm1, -1.0, %v683_v18  ;;  %v684_v20 = vmov (%p169_p6), 1.0   ;;  %s728_s3 = smov (%p169_p6), 1  }
  0x31   : >> { %181 = vst [vmem:[%s179_s2] sm:$0xff] %v180_v19  ;;  %171 = sbr.rel (!%p169_p6) target bundleno = 46 (0x2e), region = 188 }
  0x32   : > { %537 = vst [vmem:[%s724_s21 + $0x3f] sm:$0x1] (%p169_p6), %v684_v20 }
  0x38 LB: >> { %s190_s4 = ssub.s32 7, %s677_s3  ;;  %v194_v21 = vld [vmem:[%s724_s21] sm:$0xff]  ;;  %s189_s3 = sadd.s32 1, %s677_s3   ;;  %s677_s3 = sphi %s728_s3, %s189_s3  }
  0x39   : >> { %s538_s5 = sshll.u32 %s190_s4, 3  ;;  %s739_s11 = scalar_lea.vmem %s724_s21, %s190_s4 [#allocation1] }
  0x3a   : >> { %s192_s9 = scalar_lea.vmem [#allocation2], %s538_s5  ;;  %p186_p7 = scmp.ge.s32.totalorder %s189_s3, 8  }
  0x3b   : >> { %v735_v22 = vld [vmem:[%s192_s9] sm:$0xff]  ;;  %s679_s12 = smov (%p186_p7), 0  }
  0x3c   : >> { %v195_v23 = vmul.f32 %v194_v21, %v735_v22 }
  0x3e   : >> { %v197_v24 = vrot.slane %v195_v23, 4 }
  0x40   : >> { %v198_v25 = vadd.f32 %v197_v24, %v195_v23 }
  0x42   : >> { %v199_v26 = vrot.slane %v198_v25, 2 }
  0x44   : >> { %v200_v27 = vadd.f32 %v199_v26, %v198_v25 }
  0x46   : >> { %v201_v28 = vrot.slane %v200_v27, 1 }
  0x48   : >> { %v202_v29 = vadd.f32 %v201_v28, %v200_v27 }
  0x4a   : >> { %203 = vst [vmem:[%s739_s11] sm:$0x1] %v202_v29 }
  0x51   : >> { %v540_v30 = vld [vmem:[%s724_s21 + $0x8] sm:$0xff] }
  0x52   : >> { %v209_v31 = vmul.f32 %v540_v30, %v735_v22 }
  0x54   : >> { %v212_v32 = vrot.slane %v209_v31, 4 }
  0x56   : >> { %v213_v33 = vadd.f32 %v212_v32, %v209_v31 }
  0x58   : >> { %v214_v34 = vrot.slane %v213_v33, 2 }
  0x5a   : >> { %v215_v35 = vadd.f32 %v214_v34, %v213_v33 }
  0x5c   : >> { %v216_v36 = vrot.slane %v215_v35, 1 }
  0x5e   : >> { %v217_v37 = vadd.f32 %v216_v36, %v215_v35 }
  0x60   : >> { %541 = vst [vmem:[%s739_s11 + $0x8] sm:$0x1] %v217_v37 }
  0x67   : >> { %v543_v38 = vld [vmem:[%s724_s21 + $0x10] sm:$0xff] }
  0x68   : >> { %v224_v39 = vmul.f32 %v543_v38, %v735_v22 }
  0x6a   : >> { %v227_v40 = vrot.slane %v224_v39, 4 }
  0x6c   : >> { %v228_v41 = vadd.f32 %v227_v40, %v224_v39 }
  0x6e   : >> { %v229_v42 = vrot.slane %v228_v41, 2 }
  0x70   : >> { %v230_v43 = vadd.f32 %v229_v42, %v228_v41 }
  0x72   : >> { %v231_v44 = vrot.slane %v230_v43, 1 }
  0x74   : >> { %v232_v45 = vadd.f32 %v231_v44, %v230_v43 }
  0x76   : >> { %544 = vst [vmem:[%s739_s11 + $0x10] sm:$0x1] %v232_v45 }
  0x7d   : >> { %v546_v46 = vld [vmem:[%s724_s21 + $0x18] sm:$0xff] }
  0x7e   : >> { %v239_v47 = vmul.f32 %v546_v46, %v735_v22 }
  0x80   : >> { %v242_v48 = vrot.slane %v239_v47, 4 }
  0x82   : >> { %v243_v49 = vadd.f32 %v242_v48, %v239_v47 }
  0x84   : >> { %v244_v50 = vrot.slane %v243_v49, 2 }
  0x86   : >> { %v245_v51 = vadd.f32 %v244_v50, %v243_v49 }
  0x88   : >> { %v246_v52 = vrot.slane %v245_v51, 1 }
  0x8a   : >> { %v247_v53 = vadd.f32 %v246_v52, %v245_v51 }
  0x8c   : >> { %547 = vst [vmem:[%s739_s11 + $0x18] sm:$0x1] %v247_v53 }
  0x93   : >> { %v549_v54 = vld [vmem:[%s724_s21 + $0x20] sm:$0xff] }
  0x94   : >> { %v254_v55 = vmul.f32 %v549_v54, %v735_v22 }
  0x96   : >> { %v257_v56 = vrot.slane %v254_v55, 4 }
  0x98   : >> { %v258_v57 = vadd.f32 %v257_v56, %v254_v55 }
  0x9a   : >> { %v259_v58 = vrot.slane %v258_v57, 2 }
  0x9c   : >> { %v260_v59 = vadd.f32 %v259_v58, %v258_v57 }
  0x9e   : >> { %v261_v60 = vrot.slane %v260_v59, 1 }
  0xa0   : >> { %v262_v61 = vadd.f32 %v261_v60, %v260_v59 }
  0xa2   : >> { %550 = vst [vmem:[%s739_s11 + $0x20] sm:$0x1] %v262_v61 }
  0xa9   : >> { %v552_v62 = vld [vmem:[%s724_s21 + $0x28] sm:$0xff] }
  0xaa   : >> { %v269_v63 = vmul.f32 %v552_v62, %v735_v22 }
  0xac   : >> { %v272_v0 = vrot.slane %v269_v63, 4 }
  0xae   : >> { %v273_v1 = vadd.f32 %v272_v0, %v269_v63 }
  0xb0   : >> { %v274_v2 = vrot.slane %v273_v1, 2 }
  0xb2   : >> { %v275_v3 = vadd.f32 %v274_v2, %v273_v1 }
  0xb4   : >> { %v276_v4 = vrot.slane %v275_v3, 1 }
  0xb6   : >> { %v277_v5 = vadd.f32 %v276_v4, %v275_v3 }
  0xb8   : >> { %553 = vst [vmem:[%s739_s11 + $0x28] sm:$0x1] %v277_v5 }
  0xbf   : >> { %v555_v6 = vld [vmem:[%s724_s21 + $0x30] sm:$0xff] }
  0xc0   : >> { %v284_v7 = vmul.f32 %v555_v6, %v735_v22 }
  0xc2   : >> { %v287_v8 = vrot.slane %v284_v7, 4 }
  0xc4   : >> { %v288_v9 = vadd.f32 %v287_v8, %v284_v7 }
  0xc6   : >> { %v289_v10 = vrot.slane %v288_v9, 2 }
  0xc8   : >> { %v290_v11 = vadd.f32 %v289_v10, %v288_v9 }
  0xca   : >> { %v291_v12 = vrot.slane %v290_v11, 1 }
  0xcc   : >> { %v292_v13 = vadd.f32 %v291_v12, %v290_v11 }
  0xce   : >> { %556 = vst [vmem:[%s739_s11 + $0x30] sm:$0x1] %v292_v13 }
  0xd5   : >> { %v558_v14 = vld [vmem:[%s724_s21 + $0x38] sm:$0xff] }
  0xd6   : >> { %v299_v15 = vmul.f32 %v558_v14, %v735_v22 }
  0xd8   : >> { %v302_v16 = vrot.slane %v299_v15, 4 }
  0xda   : >> { %v303_v17 = vadd.f32 %v302_v16, %v299_v15 }
  0xdc   : >> { %v304_v18 = vrot.slane %v303_v17, 2 }
  0xde   : >> { %v305_v19 = vadd.f32 %v304_v18, %v303_v17  ;;  %188 = sbr.rel (!%p186_p7) target bundleno = 56 (0x38), region = 199 }
  0xe0   : >> { %v306_v20 = vrot.slane %v305_v19, 1 }
  0xe2   : >> { %v307_v21 = vadd.f32 %v306_v20, %v305_v19 }
  0xe4   : >> { %559 = vst [vmem:[%s739_s11 + $0x38] sm:$0x1] %v307_v21 }
  0xe5 LB: >> { %s315_s13 = scalar_lea.vmem [#allocation3], %s681_s12  ;;  %s560_s14 = sshll.u32 %s681_s12, 3  ;;  %s681_s12 = sphi %s679_s12, %s314_s12  }
  0xe6   : >> { %v316_v22 = vld [vmem:[%s315_s13] ss:$0 sm:$0xff]  ;;  %s318_s15 = scalar_lea.vmem %s724_s21, %s560_s14 [#allocation1]  ;;  %s314_s12 = sadd.s32 1, %s681_s12  }
  0xe7   : >> { %625 = vrcp.f32 %v316_v22  ;;  %vm322_vm2 = vweird.f32 %v316_v22  ;;  %p311_p8 = scmp.ge.s32.totalorder %s314_s12, 8  }
  0xe8   : > { %s562_s16 = sshll.u32 (%p311_p8), %s657_s6, 3 }
  0xe9   : > { %s336_s19 = scalar_lea.vmem (%p311_p8), %s789_s1, %s562_s16 }
  0xeb   : >> { %v319_v23 = vld [vmem:[%s318_s15] sm:$0xff] }
  0xef   : > { %313 = sbr.rel (!%p311_p8) target bundleno = 229 (0xe5), region = 210 }
  0xf1   : >> { %v626_v24 = vpop.eup %625 }
  0xf2   : >> { %v321_v25 = vmul.f32 %v626_v24, %v319_v23 }
  0xf4   : >> { %v323_v26 = vsel %vm322_vm2, %v319_v23, %v321_v25 }
  0xf5   : >> { %324 = vst [vmem:[%s318_s15] sm:$0xff] %v323_v26 }
  0xfc   : > { %v378_v27 = vld [vmem:[%s724_s21] sm:$0xff]  ;;  %v380_v28 = vld [vmem:[%s724_s21 + $0x8] sm:$0xff]  ;;  %v382_v29 = vld [vmem:[%s724_s21 + $0x10] sm:$0xff] }
  0xfd   : > { %v384_v30 = vld [vmem:[%s724_s21 + $0x18] sm:$0xff]  ;;  %v386_v31 = vld [vmem:[%s724_s21 + $0x20] sm:$0xff]  ;;  %v388_v32 = vld [vmem:[%s724_s21 + $0x28] sm:$0xff]  ;;  %379 = vst [vmem:[%s336_s19] sm:$0xff] %v378_v27 }
  0xfe   : > { %381 = vst [vmem:[%s336_s19 + $0x10] sm:$0xff] %v380_v28  ;;  %383 = vst [vmem:[%s336_s19 + $0x20] sm:$0xff] %v382_v29  ;;  %v390_v33 = vld [vmem:[%s724_s21 + $0x30] sm:$0xff]  ;;  %v392_v34 = vld [vmem:[%s724_s21 + $0x38] sm:$0xff] }
  0xff   : > { %385 = vst [vmem:[%s336_s19 + $0x30] sm:$0xff] %v384_v30  ;;  %387 = vst [vmem:[%s336_s19 + $0x40] sm:$0xff] %v386_v31 }
 0x100   : > { %389 = vst [vmem:[%s336_s19 + $0x50] sm:$0xff] %v388_v32  ;;  %391 = vst [vmem:[%s336_s19 + $0x60] sm:$0xff] %v390_v33 }
 0x101   : > { %393 = vst [vmem:[%s336_s19 + $0x70] sm:$0xff] %v392_v34 }
 0x102 PF: > { %s7_s8 = sadd.s32 1, %s665_s8   ;;  %s790_s6 = smov %s661_s7 }
 0x103   : > { %p4_p9 = scmp.ge.s32.totalorder %s7_s8, 4   ;;  %s791_s7 = smov %s793_s10 }
 0x105   :  { %6 = sbr.rel (!%p4_p9) target bundleno = 2 (0x2), region = 221 }

// kernel: _lambda_.1
= control target key start
LH: loop header
LB: loop body
LE: loop exit
PB: predicated region body
PF: predicated region fallthrough
CT: control target
= control target key end

     0   :  { %s1197_s18 = smov 0   ;;  %s1199_s19 = smov 0   ;;  %s1417_s0 = inlined_call_operand.vmem [shape: f32[4,2,256], index: 0, kind: input, shape index: {}]   ;;  %s1418_s1 = inlined_call_operand.vmem [shape: f32[4,2,256], index: 1, kind: input, shape index: {}]   ;;  %s1419_s2 = inlined_call_operand.vmem [shape: f32[4,8,256], index: 2, kind: input, shape index: {}]   ;;  %s1420_s3 = inlined_call_operand.vmem [shape: f32[4,8,256], index: 3, kind: input, shape index: {}]   ;;  %s1421_s4 = inlined_call_operand.vmem [shape: f32[2,8,256], index: 4, kind: output, shape index: {0}]   ;;  %s1422_s5 = inlined_call_operand.vmem [shape: f32[2,8,256], index: 5, kind: output, shape index: {1}]  }
   0x1   :  { %s1201_s20 = smov 0  }
   0x2 LB: > { %s1213_s21 = sadd.s32 4294967295, %s1164_s20   ;;  %s1216_s22 = sadd.s32 1, %s1164_s20   ;;  %s1164_s20 = sphi %s1201_s20, %s1427_s20   ;;  %s1160_s19 = sphi %s1199_s19, %s1426_s19   ;;  %s1156_s18 = sphi %s1197_s18, %s1425_s18  }
   0x3   : > { %s20_s23 = ssub.s32 %s1164_s20, %s1216_s22  ;;  %s23_s24 = sadd.s32 1, %s1160_s19 }
   0x4   : > { %p21_p0 = scmp.eq.s32.totalorder %s20_s23, 0  ;;  %p30_p1 = scmp.ne.s32.totalorder %s1160_s19, %s1156_s18 }
   0x5   : > { %p31_p2 = scmp.eq.s32.totalorder %s1164_s20, 0  ;;  %p138_p3 = scmp.eq.s32.totalorder %s1213_s21, 1 }
   0x6   : > { %s1226_s25 = scalar_select %p21_p0, %s1160_s19, %s23_s24  }
   0x7   : > { %p1228_p4 = por %p31_p2, %p30_p1  ;;  %p1232_p5 = por %p138_p3, %p30_p1 }
   0x8   : > { %p1075_p6 = scmp.ge.s32.totalorder %s1164_s20, 2 }
   0xa   : > { %186 = sbr.rel (%p1075_p6) target bundleno = 45 (0x2d), region = 16 }
  0x11   : > { %189 = sbr.rel (!%p1228_p4) target bundleno = 24 (0x18), region = 20  ;;  %s191_s28 = sand.u32 (%p1228_p4), 1, %s1160_s19  }
  0x12   : > { %s1077_s29 = sshll.u32 (%p1228_p4), %s1164_s20, 1  ;;  %s1076_s30 = sshll.u32 (%p1228_p4), %s191_s28, 3 }
  0x13   : > { %s195_s8 = scalar_lea.vmem (%p1228_p4), %s1417_s0, %s1077_s29  ;;  %s193_s9 = scalar_lea.vmem (%p1228_p4), [#allocation2], %s1076_s30 }
  0x14   : > { %v211_v0 = vld [vmem:[%s195_s8] sm:$0x3] (%p1228_p4)  ;;  %v213_v1 = vld [vmem:[%s195_s8 + $0x4] sm:$0x3] (%p1228_p4)  ;;  %v215_v2 = vld [vmem:[%s195_s8 + $0x8] sm:$0x3] (%p1228_p4) }
  0x15   : > { %212 = vst [vmem:[%s193_s9] sm:$0x3] (%p1228_p4), %v211_v0  ;;  %214 = vst [vmem:[%s193_s9 + $0x2] sm:$0x3] (%p1228_p4), %v213_v1  ;;  %v217_v3 = vld [vmem:[%s195_s8 + $0xc] sm:$0x3] (%p1228_p4) }
  0x16   : > { %216 = vst [vmem:[%s193_s9 + $0x4] sm:$0x3] (%p1228_p4), %v215_v2  ;;  %218 = vst [vmem:[%s193_s9 + $0x6] sm:$0x3] (%p1228_p4), %v217_v3 }
  0x18 PF: > { %249 = sbr.rel (!%p1228_p4) target bundleno = 31 (0x1f), region = 61  ;;  %s251_s10 = sand.u32 (%p1228_p4), 1, %s1160_s19  }
  0x19   : > { %s1079_s11 = sshll.u32 (%p1228_p4), %s1164_s20, 1  ;;  %s1078_s12 = sshll.u32 (%p1228_p4), %s251_s10, 3 }
  0x1a   : > { %s255_s15 = scalar_lea.vmem (%p1228_p4), %s1418_s1, %s1079_s11  ;;  %s253_s16 = scalar_lea.vmem (%p1228_p4), [#allocation3], %s1078_s12 }
  0x1b   : > { %v271_v4 = vld [vmem:[%s255_s15] sm:$0x3] (%p1228_p4)  ;;  %v273_v5 = vld [vmem:[%s255_s15 + $0x4] sm:$0x3] (%p1228_p4)  ;;  %v275_v6 = vld [vmem:[%s255_s15 + $0x8] sm:$0x3] (%p1228_p4) }
  0x1c   : > { %272 = vst [vmem:[%s253_s16] sm:$0x3] (%p1228_p4), %v271_v4  ;;  %274 = vst [vmem:[%s253_s16 + $0x2] sm:$0x3] (%p1228_p4), %v273_v5  ;;  %v277_v7 = vld [vmem:[%s255_s15 + $0xc] sm:$0x3] (%p1228_p4) }
  0x1d   : > { %276 = vst [vmem:[%s253_s16 + $0x4] sm:$0x3] (%p1228_p4), %v275_v6  ;;  %278 = vst [vmem:[%s253_s16 + $0x6] sm:$0x3] (%p1228_p4), %v277_v7 }
  0x1f PF: > { %309 = sbr.rel (!%p1228_p4) target bundleno = 38 (0x26), region = 102  ;;  %s311_s17 = sand.u32 (%p1228_p4), 1, %s1160_s19  }
  0x20   : > { %s1081_s23 = sshll.u32 (%p1228_p4), %s1164_s20, 3  ;;  %s1080_s24 = sshll.u32 (%p1228_p4), %s311_s17, 5 }
  0x21   : > { %s315_s30 = scalar_lea.vmem (%p1228_p4), %s1419_s2, %s1081_s23  ;;  %s313_s6 = scalar_lea.vmem (%p1228_p4), [#allocation4], %s1080_s24 }
  0x22   : > { %v349_v8 = vld [vmem:[%s315_s30] sm:$0xff] (%p1228_p4)  ;;  %v351_v9 = vld [vmem:[%s315_s30 + $0x10] sm:$0xff] (%p1228_p4) }
  0x23   : > { %v353_v10 = vld [vmem:[%s315_s30 + $0x20] sm:$0xff] (%p1228_p4)  ;;  %350 = vst [vmem:[%s313_s6] sm:$0xff] (%p1228_p4), %v349_v8  ;;  %352 = vst [vmem:[%s313_s6 + $0x8] sm:$0xff] (%p1228_p4), %v351_v9  ;;  %v355_v11 = vld [vmem:[%s315_s30 + $0x30] sm:$0xff] (%p1228_p4) }
  0x24   : > { %354 = vst [vmem:[%s313_s6 + $0x10] sm:$0xff] (%p1228_p4), %v353_v10  ;;  %356 = vst [vmem:[%s313_s6 + $0x18] sm:$0xff] (%p1228_p4), %v355_v11 }
  0x26 PF: > { %362 = sbr.rel (!%p1228_p4) target bundleno = 45 (0x2d), region = 140  ;;  %s364_s7 = sand.u32 (%p1228_p4), 1, %s1160_s19  }
  0x27   : > { %s1083_s8 = sshll.u32 (%p1228_p4), %s1164_s20, 3  ;;  %s1082_s9 = sshll.u32 (%p1228_p4), %s364_s7, 5 }
  0x28   : > { %s368_s12 = scalar_lea.vmem (%p1228_p4), %s1420_s3, %s1083_s8  ;;  %s366_s13 = scalar_lea.vmem (%p1228_p4), [#allocation5], %s1082_s9 }
  0x29   : > { %v402_v12 = vld [vmem:[%s368_s12] sm:$0xff] (%p1228_p4)  ;;  %v404_v13 = vld [vmem:[%s368_s12 + $0x10] sm:$0xff] (%p1228_p4) }
  0x2a   : > { %v406_v14 = vld [vmem:[%s368_s12 + $0x20] sm:$0xff] (%p1228_p4)  ;;  %403 = vst [vmem:[%s366_s13] sm:$0xff] (%p1228_p4), %v402_v12  ;;  %405 = vst [vmem:[%s366_s13 + $0x8] sm:$0xff] (%p1228_p4), %v404_v13  ;;  %v408_v15 = vld [vmem:[%s368_s12 + $0x30] sm:$0xff] (%p1228_p4) }
  0x2b   : > { %407 = vst [vmem:[%s366_s13 + $0x10] sm:$0xff] (%p1228_p4), %v406_v14  ;;  %409 = vst [vmem:[%s366_s13 + $0x18] sm:$0xff] (%p1228_p4), %v408_v15 }
  0x2d PF: > { %p1084_p7 = scmp.ge.s32.totalorder %s1164_s20, 1  ;;  %p414_p8 = scmp.lt.s32.totalorder %s1164_s20, 3 }
  0x2f   : > { %p415_p9 = pnand %p1084_p7, %p414_p8 }
  0x30   : > { %s1268_s26 = sand.u32 (!%p415_p9), 1, %s1156_s18   ;;  %v497_v16 = vlaneseq (!%p415_p9)  ;;  %v1166_v17 = vmov (!%p415_p9), 1966171168  }
  0x31   : > { %418 = sbr.rel (%p415_p9) target bundleno = 96 (0x60), region = 178  ;;  %s1085_s14 = sshll.u32 (!%p415_p9), %s1268_s26, 3  ;;  %v495_v18 = vunpack.c.l.s4 (!%p415_p9), %v1166_v17 }
  0x32   : > { %s1087_s15 = sshll.u32 (!%p415_p9), %s1268_s26, 5  ;;  %v498_v19 = vshrl.u32 (!%p415_p9), %v497_v16, 7  ;;  %s1272_s16 = scalar_lea.vmem (!%p415_p9), [#allocation2], %s1085_s14 }
  0x33   : > { %v1091_v20 = vld.sshfl [vmem:[%s1272_s16] sm:$0x11 pattern:$0x75316420] (!%p415_p9)  ;;  %v496_v21 = vunpack.c.0.s8 (!%p415_p9), %v495_v18  ;;  %s1275_s20 = scalar_lea.vmem (!%p415_p9), [#allocation3], %s1085_s14  ;;  %s1285_s18 = scalar_lea.vmem (!%p415_p9), [#allocation4], %s1087_s15 }
  0x34   : > { %v493_v22 = vcombine.high (!%p415_p9), %v1091_v20, %v1091_v20  ;;  %v1092_v23 = vld.sshfl [vmem:[%s1275_s20] sm:$0x11 pattern:$0x75316420] (!%p415_p9)  ;;  %v1280_v26 = vsub.s32 (!%p415_p9), 0, %v498_v19  ;;  %v1288_v30 = vld [vmem:[%s1285_s18] sm:$0xff] (!%p415_p9) }
  0x35   : > { %v1278_v24 = vsub.s32 (!%p415_p9), %v496_v21, %v498_v19  ;;  %v517_v25 = vcombine.high (!%p415_p9), %v1092_v23, %v1092_v23  ;;  %v1094_v27 = vld.sshfl [vmem:[%s1272_s16 + $0x2] sm:$0x11 pattern:$0x75316420] (!%p415_p9)  ;;  %s1292_s17 = scalar_lea.vmem (!%p415_p9), [#allocation5], %s1087_s15  ;;  %v1322_v55 = vld [vmem:[%s1285_s18 + $0x10] sm:$0xff] (!%p415_p9) }
  0x36   : > { %v580_v31 = vcombine.high (!%p415_p9), %v1094_v27, %v1094_v27  ;;  %v1096_v33 = vld.sshfl [vmem:[%s1275_s20 + $0x2] sm:$0x11 pattern:$0x75316420] (!%p415_p9)  ;;  %v1295_v34 = vld [vmem:[%s1292_s17] sm:$0xff] (!%p415_p9)  ;;  %v1299_v37 = vld [vmem:[%s1285_s18 + $0x8] sm:$0xff] (!%p415_p9) }
  0x37   : > { %v500_v28 = vrot.slane (!%p415_p9), %v1091_v20, %v1278_v24  ;;  %v524_v29 = vrot.slane (!%p415_p9), %v1092_v23, %v1278_v24  ;;  %v587_v32 = vrot.slane (!%p415_p9), %v1094_v27, %v1278_v24  ;;  %v605_v35 = vcombine.high (!%p415_p9), %v1096_v33, %v1096_v33  ;;  %v1100_v38 = vld.sshfl [vmem:[%s1272_s16 + $0x4] sm:$0x11 pattern:$0x75316420] (!%p415_p9)  ;;  %v1325_v56 = vld [vmem:[%s1292_s17 + $0x10] sm:$0xff] (!%p415_p9)  ;;  %v1334_v63 = vld [vmem:[%s1285_s18 + $0x18] sm:$0xff] (!%p415_p9) }
  0x38   : > { %v612_v36 = vrot.slane %v1096_v33, %v1278_v24  ;;  %v507_v39 = vrot.slane %v493_v22, %v1278_v24  ;;  %v531_v40 = vrot.slane %v517_v25, %v1278_v24  ;;  %v1307_v43 = vld [vmem:[%s1292_s17 + $0x8] sm:$0xff]  ;;  %v670_v45 = vcombine.high %v1100_v38, %v1100_v38  ;;  %v1102_v46 = vld.sshfl [vmem:[%s1275_s20 + $0x4] sm:$0x11 pattern:$0x75316420]  ;;  %s1089_s23 = sshll.u32 %s1268_s26, 4 }
  0x39   : > { %v537_v41 = vrot.slane %v500_v28, %v1280_v26  ;;  %v549_v42 = vrot.slane %v524_v29, %v1280_v26  ;;  %v1310_v44 = vrot.slane %v587_v32, %v1280_v26  ;;  %v677_v48 = vrot.slane %v1100_v38, %v1278_v24  ;;  %v1106_v51 = vld.sshfl [vmem:[%s1272_s16 + $0x6] sm:$0x11 pattern:$0x75316420]  ;;  %v1337_v1 = vld [vmem:[%s1292_s17 + $0x18] sm:$0xff]  ;;  %s1368_s24 = scalar_lea.vmem [#allocation6], %s1089_s23 }
  0x3a   : > { %v639_v47 = vrot.slane %v612_v36, %v1280_v26  ;;  %v695_v49 = vcombine.high %v1102_v46, %v1102_v46  ;;  %v702_v50 = vrot.slane %v1102_v46, %v1278_v24  ;;  %v767_v57 = vrot.slane %v1106_v51, %v1278_v24  ;;  %v1108_v58 = vld.sshfl [vmem:[%s1275_s20 + $0x6] sm:$0x11 pattern:$0x75316420]  ;;  %s483_s28 = scalar_lea.vmem [#allocation7], %s1089_s23  ;;  %s1113_s29 = sshll.u32 (%p1232_p5), %s1213_s21, 3 }
  0x3b   : > { %v544_v52 = vmul.f32 %v537_v41, %v1288_v30  ;;  %v556_v53 = vmul.f32 %v549_v42, %v1295_v34  ;;  %v634_v54 = vmul.f32 %v1299_v37, %v1310_v44  ;;  %v717_v60 = vrot.slane %v677_v48, %v1280_v26  ;;  %s856_s7 = scalar_lea.vmem (%p1232_p5), %s1421_s4, %s1113_s29 }
  0x3c   : > { %v646_v59 = vmul.f32 %v1307_v43, %v639_v47  ;;  %v729_v61 = vrot.slane %v702_v50, %v1280_v26  ;;  %v792_v62 = vrot.slane %v1108_v58, %v1278_v24  ;;  %v807_v2 = vrot.slane %v767_v57, %v1280_v26 }
  0x3d   : > { %v558_v0 = vsub.f32 %v544_v52, %v556_v53  ;;  %v541_v3 = vrot.slane %v507_v39, %v1280_v26  ;;  %v553_v4 = vrot.slane %v531_v40, %v1280_v26  ;;  %v724_v6 = vmul.f32 %v1322_v55, %v717_v60 }
  0x3e   : > { %v648_v5 = vsub.f32 %v634_v54, %v646_v59  ;;  %v736_v7 = vmul.f32 %v1325_v56, %v729_v61  ;;  %v819_v8 = vrot.slane %v792_v62, %v1280_v26  ;;  %v814_v9 = vmul.f32 %v1334_v63, %v807_v2 }
  0x3f   : > { %v545_v10 = vmul.f32 %v541_v3, %v1288_v30  ;;  %v557_v11 = vmul.f32 %v553_v4, %v1295_v34  ;;  %v594_v12 = vrot.slane %v580_v31, %v1278_v24  ;;  %v619_v16 = vrot.slane %v605_v35, %v1278_v24 }
  0x40   : > { %v650_v13 = vadd.f32 %v648_v5, %v558_v0  ;;  %v738_v14 = vsub.f32 %v724_v6, %v736_v7  ;;  %v826_v15 = vmul.f32 %v1337_v1, %v819_v8  ;;  %v684_v19 = vrot.slane %v670_v45, %v1278_v24 }
  0x41   : > { %v559_v17 = vsub.f32 %v545_v10, %v557_v11  ;;  %v631_v18 = vrot.slane %v594_v12, %v1280_v26  ;;  %v709_v20 = vrot.slane %v695_v49, %v1278_v24  ;;  %v643_v23 = vrot.slane %v619_v16, %v1280_v26 }
  0x42   : > { %v740_v21 = vadd.f32 %v738_v14, %v650_v13  ;;  %v828_v22 = vsub.f32 %v814_v9, %v826_v15  ;;  %v760_v25 = vcombine.high %v1106_v51, %v1106_v51  ;;  %v721_v28 = vrot.slane %v684_v19, %v1280_v26 }
  0x43   : > { %v635_v27 = vmul.f32 %v1299_v37, %v631_v18  ;;  %v733_v29 = vrot.slane %v709_v20, %v1280_v26  ;;  %v785_v31 = vcombine.high %v1108_v58, %v1108_v58  ;;  %v647_v33 = vmul.f32 %v1307_v43, %v643_v23 }
  0x44   : > { %v830_v32 = vadd.f32 %v828_v22, %v740_v21  ;;  %v774_v35 = vrot.slane %v760_v25, %v1278_v24  ;;  %v562_v36 = vmul.f32 %v549_v42, %v1288_v30  ;;  %v725_v38 = vmul.f32 %v1322_v55, %v721_v28 }
  0x45   : > { %v737_v39 = vmul.f32 %v1325_v56, %v733_v29  ;;  %v799_v40 = vrot.slane %v785_v31, %v1278_v24  ;;  %v564_v45 = vmul.f32 %v537_v41, %v1295_v34  ;;  %v649_v46 = vsub.f32 %v635_v27, %v647_v33 }
  0x46   : > { %840 = vst [vmem:[%s1368_s24] sm:$0xff] %v830_v32  ;;  %v811_v48 = vrot.slane %v774_v35, %v1280_v26  ;;  %v652_v49 = vmul.f32 %v1299_v37, %v639_v47  ;;  %v654_v42 = vmul.f32 %v1307_v43, %v1310_v44  ;;  %v742_v24 = vmul.f32 %v1322_v55, %v729_v61 }
  0x47   : > { %v739_v50 = vsub.f32 %v725_v38, %v737_v39  ;;  %v823_v51 = vrot.slane %v799_v40, %v1280_v26  ;;  %v566_v52 = vadd.f32 %v564_v45, %v562_v36  ;;  %v651_v41 = vadd.f32 %v649_v46, %v559_v17 }
  0x48   : > { %v815_v53 = vmul.f32 %v1334_v63, %v811_v48  ;;  %v656_v54 = vadd.f32 %v654_v42, %v652_v49  ;;  %v744_v57 = vmul.f32 %v1325_v56, %v717_v60  ;;  %v832_v59 = vmul.f32 %v1334_v63, %v819_v8 }
  0x49   : > { %v827_v58 = vmul.f32 %v1337_v1, %v823_v51  ;;  %v834_v47 = vmul.f32 %v1337_v1, %v807_v2  ;;  %v563_v44 = vmul.f32 %v553_v4, %v1288_v30  ;;  %v741_v62 = vadd.f32 %v739_v50, %v651_v41 }
  0x4a   : > { %v658_v0 = vadd.f32 %v656_v54, %v566_v52  ;;  %v746_v26 = vadd.f32 %v744_v57, %v742_v24  ;;  %v565_v61 = vmul.f32 %v541_v3, %v1295_v34  ;;  %v653_v7 = vmul.f32 %v1299_v37, %v643_v23 }
  0x4b   : > { %v829_v5 = vsub.f32 %v815_v53, %v827_v58  ;;  %v836_v6 = vadd.f32 %v834_v47, %v832_v59  ;;  %v655_v60 = vmul.f32 %v1307_v43, %v631_v18  ;;  %v743_v8 = vmul.f32 %v1322_v55, %v733_v29 }
  0x4c   : > { %v748_v9 = vadd.f32 %v746_v26, %v658_v0  ;;  %v567_v10 = vadd.f32 %v565_v61, %v563_v44  ;;  %v745_v2 = vmul.f32 %v1325_v56, %v721_v28  ;;  %v833_v11 = vmul.f32 %v1334_v63, %v823_v51 }
  0x4d   : > { %v831_v30 = vadd.f32 %v829_v5, %v741_v62  ;;  %v657_v4 = vadd.f32 %v655_v60, %v653_v7  ;;  %v835_v12 = vmul.f32 %v1337_v1, %v811_v48  ;;  %v886_v55 = vld [vmem:[%s1368_s24] sm:$0xff] (%p1232_p5) }
  0x4e   : > { %v838_v34 = vadd.f32 %v836_v6, %v748_v9  ;;  %v747_v3 = vadd.f32 %v745_v2, %v743_v8  ;;  %887 = vst [vmem:[%s856_s7] sm:$0xff] (%p1232_p5), %v886_v55 }
  0x4f   : > { %841 = vst [vmem:[%s1368_s24 + $0x8] sm:$0xff] %v831_v30  ;;  %v659_v13 = vadd.f32 %v657_v4, %v567_v10  ;;  %v837_v14 = vadd.f32 %v835_v12, %v833_v11  ;;  %854 = sbr.rel (!%p1232_p5) target bundleno = 88 (0x58), region = 198 }
  0x50   : > { %842 = vst [vmem:[%s483_s28] sm:$0xff] %v838_v34 }
  0x51   : > { %v749_v37 = vadd.f32 %v747_v3, %v659_v13 }
  0x53   : > { %v839_v43 = vadd.f32 %v837_v14, %v749_v37 }
  0x55   : > { %843 = vst [vmem:[%s483_s28 + $0x8] sm:$0xff] %v839_v43 }
  0x56   : > { %v888_v56 = vld [vmem:[%s1368_s24 + $0x8] sm:$0xff] }
  0x57   : > { %889 = vst [vmem:[%s856_s7 + $0x10] sm:$0xff] %v888_v56 }
  0x58 PF: > { %895 = sbr.rel (!%p1232_p5) target bundleno = 96 (0x60), region = 236  ;;  %s1114_s8 = sshll.u32 (%p1232_p5), %s1213_s21, 3 }
  0x59   : > { %v927_v63 = vld [vmem:[%s483_s28] sm:$0xff] (%p1232_p5)  ;;  %s897_s11 = scalar_lea.vmem (%p1232_p5), %s1422_s5, %s1114_s8 }
  0x5a   : > { %928 = vst [vmem:[%s897_s11] sm:$0xff] (%p1232_p5), %v927_v63 }
  0x5e   : > { %v929_v1 = vld [vmem:[%s483_s28 + $0x8] sm:$0xff] (%p1232_p5) }
  0x5f   : > { %930 = vst [vmem:[%s897_s11 + $0x10] sm:$0xff] %v929_v1 }
  0x60 PF: > { %p13_p10 = scmp.ge.s32.totalorder %s1216_s22, 4   ;;  %s1425_s18 = smov %s1160_s19 }
  0x61   : > { %s1426_s19 = smov %s1226_s25  ;;  %s1427_s20 = smov %s1216_s22 }
  0x62   :  { %15 = sbr.rel (!%p13_p10) target bundleno = 2 (0x2), region = 353 }

// kernel: reverse.0
= control target key start
LH: loop header
LB: loop body
LE: loop exit
PB: predicated region body
PF: predicated region fallthrough
CT: control target
= control target key end

     0   :  { %v103_v3 = vlaneseq  ;;  %v96_v18 = vld [vmem:[#allocation0 + $0x7] ss:$-1 sm:$0xff]  ;;  %v110_v19 = vld [vmem:[#allocation0 + $0x17] ss:$-1 sm:$0xff]  ;;  %s604_s0 = inlined_call_operand.vmem [shape: f32[2,8,16,7], index: 0, kind: input, shape index: {}]   ;;  %s605_s1 = inlined_call_operand.vmem [shape: f32[2,8,16,7], index: 1, kind: output, shape index: {}]  }
   0x1   :  { %v60_v0 = vld [vmem:[%s604_s0] sm:$0xff]  ;;  %v62_v1 = vld [vmem:[%s604_s0 + $0x8] sm:$0xff]  ;;  %v64_v2 = vld [vmem:[%s604_s0 + $0x10] sm:$0xff]  ;;  %v97_v20 = vrot.slane %v96_v18, 1  ;;  %v111_v21 = vrot.slane %v110_v19, 1 }
   0x2   :  { %61 = vst [vmem:[#allocation0 + $0x8] sm:$0xff] %v60_v0  ;;  %63 = vst [vmem:[#allocation0 + $0x18] sm:$0xff] %v62_v1  ;;  %v66_v4 = vld [vmem:[%s604_s0 + $0x18] sm:$0xff]  ;;  %v68_v5 = vld [vmem:[%s604_s0 + $0x20] sm:$0xff]  ;;  %v500_v10 = vshrl.u32 %v103_v3, 7 }
   0x3   :  { %65 = vst [vmem:[#allocation0 + $0x28] sm:$0xff] %v64_v2  ;;  %v70_v6 = vld [vmem:[%s604_s0 + $0x28] sm:$0xff]  ;;  %67 = vst [vmem:[#allocation0 + $0x38] sm:$0xff] %v66_v4  ;;  %v72_v7 = vld [vmem:[%s604_s0 + $0x30] sm:$0xff] }
   0x4   :  { %69 = vst [vmem:[#allocation0 + $0x48] sm:$0xff] %v68_v5  ;;  %71 = vst [vmem:[#allocation0 + $0x58] sm:$0xff] %v70_v6  ;;  %v74_v8 = vld [vmem:[%s604_s0 + $0x38] sm:$0xff]  ;;  %v76_v9 = vld [vmem:[%s604_s0 + $0x40] sm:$0xff]  ;;  %vm105_vm0 = vcmp.lt.s32.totalorder %v500_v10, 7 }
   0x5   :  { %73 = vst [vmem:[#allocation0 + $0x68] sm:$0xff] %v72_v7  ;;  %75 = vst [vmem:[#allocation0 + $0x78] sm:$0xff] %v74_v8  ;;  %v78_v11 = vld [vmem:[%s604_s0 + $0x48] sm:$0xff]  ;;  %v80_v12 = vld [vmem:[%s604_s0 + $0x50] sm:$0xff] }
   0x6   :  { %77 = vst [vmem:[#allocation0 + $0x88] sm:$0xff] %v76_v9  ;;  %v82_v13 = vld [vmem:[%s604_s0 + $0x58] sm:$0xff]  ;;  %79 = vst [vmem:[#allocation0 + $0x98] sm:$0xff] %v78_v11  ;;  %v84_v14 = vld [vmem:[%s604_s0 + $0x60] sm:$0xff] }
   0x7   :  { %81 = vst [vmem:[#allocation0 + $0xa8] sm:$0xff] %v80_v12  ;;  %83 = vst [vmem:[#allocation0 + $0xb8] sm:$0xff] %v82_v13  ;;  %v86_v15 = vld [vmem:[%s604_s0 + $0x68] sm:$0xff]  ;;  %v88_v16 = vld [vmem:[%s604_s0 + $0x70] sm:$0xff] }
   0x8   :  { %85 = vst [vmem:[#allocation0 + $0xc8] sm:$0xff] %v84_v14  ;;  %87 = vst [vmem:[#allocation0 + $0xd8] sm:$0xff] %v86_v15  ;;  %v90_v17 = vld [vmem:[%s604_s0 + $0x78] sm:$0xff]  ;;  %v124_v22 = vld [vmem:[#allocation0 + $0x27] ss:$-1 sm:$0xff] }
   0x9   :  { %89 = vst [vmem:[#allocation0 + $0xe8] sm:$0xff] %v88_v16  ;;  %91 = vst [vmem:[#allocation0 + $0xf8] sm:$0xff] %v90_v17  ;;  %v138_v23 = vld [vmem:[#allocation0 + $0x37] ss:$-1 sm:$0xff]  ;;  %v125_v24 = vrot.slane %v124_v22, 1 }
   0xa   :  { %v139_v25 = vrot.slane %v138_v23, 1  ;;  %v152_v26 = vld [vmem:[#allocation0 + $0x47] ss:$-1 sm:$0xff]  ;;  %v166_v27 = vld [vmem:[#allocation0 + $0x57] ss:$-1 sm:$0xff]  ;;  %98 = vst [vmem:[#allocation1] sm:$0xff] %v97_v20 }
   0xb   :  { %v101_v28 = vld [vmem:[#allocation0 + $0xf] ss:$-1 sm:$0xff]  ;;  %112 = vst [vmem:[#allocation1 + $0x8] sm:$0xff] %v111_v21  ;;  %v115_v29 = vld [vmem:[#allocation0 + $0x1f] ss:$-1 sm:$0xff]  ;;  %126 = vst [vmem:[#allocation1 + $0x10] sm:$0xff] %v125_v24 }
   0xc   :  { %v129_v30 = vld [vmem:[#allocation0 + $0x2f] ss:$-1 sm:$0xff]  ;;  %v102_v31 = vrot.slane %v101_v28, 1  ;;  %v116_v32 = vrot.slane %v115_v29, 1  ;;  %140 = vst [vmem:[#allocation1 + $0x18] sm:$0xff] %v139_v25  ;;  %v153_v35 = vrot.slane %v152_v26, 1 }
   0xd   :  { %v130_v33 = vrot.slane %v129_v30, 1  ;;  %v143_v34 = vld [vmem:[#allocation0 + $0x3f] ss:$-1 sm:$0xff]  ;;  %v157_v37 = vld [vmem:[#allocation0 + $0x4f] ss:$-1 sm:$0xff]  ;;  %v167_v38 = vrot.slane %v166_v27, 1 }
   0xe   :  { %v144_v36 = vrot.slane %v143_v34, 1  ;;  %v171_v39 = vld [vmem:[#allocation0 + $0x5f] ss:$-1 sm:$0xff]  ;;  %106 = vst.msk [vmem:[#allocation1] sm:$0xff] %vm105_vm0, %v102_v31  ;;  %120 = vst.msk [vmem:[#allocation1 + $0x8] sm:$0xff] %vm105_vm0, %v116_v32  ;;  %v158_v40 = vrot.slane %v157_v37, 1 }
   0xf   :  { %134 = vst.msk [vmem:[#allocation1 + $0x10] sm:$0xff] %vm105_vm0, %v130_v33  ;;  %154 = vst [vmem:[#allocation1 + $0x20] sm:$0xff] %v153_v35  ;;  %v172_v41 = vrot.slane %v171_v39, 1  ;;  %v180_v42 = vld [vmem:[#allocation0 + $0x67] ss:$-1 sm:$0xff] }
  0x10   :  { %v185_v43 = vld [vmem:[#allocation0 + $0x6f] ss:$-1 sm:$0xff]  ;;  %148 = vst.msk [vmem:[#allocation1 + $0x18] sm:$0xff] %vm105_vm0, %v144_v36  ;;  %168 = vst [vmem:[#allocation1 + $0x28] sm:$0xff] %v167_v38  ;;  %v181_v44 = vrot.slane %v180_v42, 1 }
  0x11   :  { %v186_v45 = vrot.slane %v185_v43, 1  ;;  %v194_v46 = vld [vmem:[#allocation0 + $0x77] ss:$-1 sm:$0xff]  ;;  %v199_v47 = vld [vmem:[#allocation0 + $0x7f] ss:$-1 sm:$0xff]  ;;  %162 = vst.msk [vmem:[#allocation1 + $0x20] sm:$0xff] %vm105_vm0, %v158_v40 }
  0x12   :  { %176 = vst.msk [vmem:[#allocation1 + $0x28] sm:$0xff] %vm105_vm0, %v172_v41  ;;  %v195_v48 = vrot.slane %v194_v46, 1  ;;  %v200_v49 = vrot.slane %v199_v47, 1  ;;  %v208_v50 = vld [vmem:[#allocation0 + $0x87] ss:$-1 sm:$0xff]  ;;  %182 = vst [vmem:[#allocation1 + $0x30] sm:$0xff] %v181_v44 }
  0x13   :  { %v213_v51 = vld [vmem:[#allocation0 + $0x8f] ss:$-1 sm:$0xff]  ;;  %v209_v52 = vrot.slane %v208_v50, 1  ;;  %v222_v54 = vld [vmem:[#allocation0 + $0x97] ss:$-1 sm:$0xff]  ;;  %190 = vst.msk [vmem:[#allocation1 + $0x30] sm:$0xff] %vm105_vm0, %v186_v45 }
  0x14   :  { %v214_v53 = vrot.slane %v213_v51, 1  ;;  %v227_v55 = vld [vmem:[#allocation0 + $0x9f] ss:$-1 sm:$0xff]  ;;  %196 = vst [vmem:[#allocation1 + $0x38] sm:$0xff] %v195_v48  ;;  %v223_v56 = vrot.slane %v222_v54, 1 }
  0x15   :  { %v228_v57 = vrot.slane %v227_v55, 1  ;;  %v236_v58 = vld [vmem:[#allocation0 + $0xa7] ss:$-1 sm:$0xff]  ;;  %v241_v59 = vld [vmem:[#allocation0 + $0xaf] ss:$-1 sm:$0xff]  ;;  %204 = vst.msk [vmem:[#allocation1 + $0x38] sm:$0xff] %vm105_vm0, %v200_v49 }
  0x16   :  { %210 = vst [vmem:[#allocation1 + $0x40] sm:$0xff] %v209_v52  ;;  %v237_v60 = vrot.slane %v236_v58, 1  ;;  %v242_v61 = vrot.slane %v241_v59, 1  ;;  %v250_v62 = vld [vmem:[#allocation0 + $0xb7] ss:$-1 sm:$0xff]  ;;  %224 = vst [vmem:[#allocation1 + $0x48] sm:$0xff] %v223_v56 }
  0x17   :  { %v255_v63 = vld [vmem:[#allocation0 + $0xbf] ss:$-1 sm:$0xff]  ;;  %218 = vst.msk [vmem:[#allocation1 + $0x40] sm:$0xff] %vm105_vm0, %v214_v53  ;;  %v251_v0 = vrot.slane %v250_v62, 1  ;;  %v264_v2 = vld [vmem:[#allocation0 + $0xc7] ss:$-1 sm:$0xff] }
  0x18   :  { %v256_v1 = vrot.slane %v255_v63, 1  ;;  %v269_v3 = vld [vmem:[#allocation0 + $0xcf] ss:$-1 sm:$0xff]  ;;  %232 = vst.msk [vmem:[#allocation1 + $0x48] sm:$0xff] %vm105_vm0, %v228_v57  ;;  %238 = vst [vmem:[#allocation1 + $0x50] sm:$0xff] %v237_v60  ;;  %v265_v4 = vrot.slane %v264_v2, 1 }
  0x19   :  { %v270_v5 = vrot.slane %v269_v3, 1  ;;  %v278_v6 = vld [vmem:[#allocation0 + $0xd7] ss:$-1 sm:$0xff]  ;;  %v283_v7 = vld [vmem:[#allocation0 + $0xdf] ss:$-1 sm:$0xff]  ;;  %246 = vst.msk [vmem:[#allocation1 + $0x50] sm:$0xff] %vm105_vm0, %v242_v61 }
  0x1a   :  { %252 = vst [vmem:[#allocation1 + $0x58] sm:$0xff] %v251_v0  ;;  %v279_v8 = vrot.slane %v278_v6, 1  ;;  %v284_v9 = vrot.slane %v283_v7, 1  ;;  %v292_v11 = vld [vmem:[#allocation0 + $0xe7] ss:$-1 sm:$0xff]  ;;  %266 = vst [vmem:[#allocation1 + $0x60] sm:$0xff] %v265_v4 }
  0x1b   :  { %v297_v12 = vld [vmem:[#allocation0 + $0xef] ss:$-1 sm:$0xff]  ;;  %260 = vst.msk [vmem:[#allocation1 + $0x58] sm:$0xff] %vm105_vm0, %v256_v1  ;;  %v293_v13 = vrot.slane %v292_v11, 1  ;;  %v306_v15 = vld [vmem:[#allocation0 + $0xf7] ss:$-1 sm:$0xff] }
  0x1c   :  { %v298_v14 = vrot.slane %v297_v12, 1  ;;  %v311_v16 = vld [vmem:[#allocation0 + $0xff] ss:$-1 sm:$0xff]  ;;  %274 = vst.msk [vmem:[#allocation1 + $0x60] sm:$0xff] %vm105_vm0, %v270_v5  ;;  %280 = vst [vmem:[#allocation1 + $0x68] sm:$0xff] %v279_v8  ;;  %v307_v17 = vrot.slane %v306_v15, 1 }
  0x1d   :  { %v312_v18 = vrot.slane %v311_v16, 1  ;;  %v374_v19 = vld [vmem:[#allocation1] sm:$0xff]  ;;  %v376_v20 = vld [vmem:[#allocation1 + $0x8] sm:$0xff]  ;;  %v378_v21 = vld [vmem:[#allocation1 + $0x10] sm:$0xff]  ;;  %288 = vst.msk [vmem:[#allocation1 + $0x68] sm:$0xff] %vm105_vm0, %v284_v9 }
  0x1e   :  { %294 = vst [vmem:[#allocation1 + $0x70] sm:$0xff] %v293_v13  ;;  %375 = vst [vmem:[%s605_s1] sm:$0xff] %v374_v19  ;;  %v380_v22 = vld [vmem:[#allocation1 + $0x18] sm:$0xff]  ;;  %v382_v23 = vld [vmem:[#allocation1 + $0x20] sm:$0xff] }
  0x1f   :  { %377 = vst [vmem:[%s605_s1 + $0x8] sm:$0xff] %v376_v20  ;;  %379 = vst [vmem:[%s605_s1 + $0x10] sm:$0xff] %v378_v21  ;;  %v384_v24 = vld [vmem:[#allocation1 + $0x28] sm:$0xff]  ;;  %v386_v25 = vld [vmem:[#allocation1 + $0x30] sm:$0xff] }
  0x20   :  { %302 = vst.msk [vmem:[#allocation1 + $0x70] sm:$0xff] %vm105_vm0, %v298_v14  ;;  %308 = vst [vmem:[#allocation1 + $0x78] sm:$0xff] %v307_v17  ;;  %v388_v26 = vld [vmem:[#allocation1 + $0x38] sm:$0xff]  ;;  %v390_v10 = vld [vmem:[#allocation1 + $0x40] sm:$0xff] }
  0x21   :  { %381 = vst [vmem:[%s605_s1 + $0x18] sm:$0xff] %v380_v22  ;;  %383 = vst [vmem:[%s605_s1 + $0x20] sm:$0xff] %v382_v23  ;;  %v392_v27 = vld [vmem:[#allocation1 + $0x48] sm:$0xff]  ;;  %v394_v28 = vld [vmem:[#allocation1 + $0x50] sm:$0xff] }
  0x22   :  { %385 = vst [vmem:[%s605_s1 + $0x28] sm:$0xff] %v384_v24  ;;  %316 = vst.msk [vmem:[#allocation1 + $0x78] sm:$0xff] %vm105_vm0, %v312_v18  ;;  %v396_v29 = vld [vmem:[#allocation1 + $0x58] sm:$0xff] }
  0x23   :  { %387 = vst [vmem:[%s605_s1 + $0x30] sm:$0xff] %v386_v25  ;;  %389 = vst [vmem:[%s605_s1 + $0x38] sm:$0xff] %v388_v26  ;;  %v398_v30 = vld [vmem:[#allocation1 + $0x60] sm:$0xff] }
  0x24   :  { %391 = vst [vmem:[%s605_s1 + $0x40] sm:$0xff] %v390_v10  ;;  %393 = vst [vmem:[%s605_s1 + $0x48] sm:$0xff] %v392_v27  ;;  %v400_v31 = vld [vmem:[#allocation1 + $0x68] sm:$0xff] }
  0x25   :  { %395 = vst [vmem:[%s605_s1 + $0x50] sm:$0xff] %v394_v28  ;;  %397 = vst [vmem:[%s605_s1 + $0x58] sm:$0xff] %v396_v29 }
  0x26   :  { %399 = vst [vmem:[%s605_s1 + $0x60] sm:$0xff] %v398_v30  ;;  %401 = vst [vmem:[%s605_s1 + $0x68] sm:$0xff] %v400_v31 }
  0x27   :  { %v402_v32 = vld [vmem:[#allocation1 + $0x70] sm:$0xff] }
  0x28   :  { %403 = vst [vmem:[%s605_s1 + $0x70] sm:$0xff] %v402_v32 }
  0x29   :  { %v404_v33 = vld [vmem:[#allocation1 + $0x78] sm:$0xff] }
  0x2a   :  { %405 = vst [vmem:[%s605_s1 + $0x78] sm:$0xff] %v404_v33 }

</bundles_post_ra>
